<compile_context>
chip_gen: v7x
topology: tpu7x:2x2x1
jax: 0.10.0
libtpu: 0.0.40
codegen_flags: <defaults>
</compile_context>

<pallas_src>
import jax
import jax.numpy as jnp
from jax.experimental import pallas as pl
from jax.experimental.pallas import tpu as pltpu

IN_DIM = 28 * 28      # 784  (logical)
HID_DIM = 400         # logical
LATENT_DIM = 20       # logical

IN_PAD = 896          # 784 -> 7*128
HID_PAD = 512         # 400 -> 4*128
LAT_PAD = 128         # 20  -> 128


def _round_up(n, m):
    return (n + m - 1) // m * m


def _vae_kernel(x_ref, eps_ref,
                w1_ref, b1_ref,
                w2_ref, b2_ref,
                w3_ref, b3_ref,
                w4_ref, b4_ref,
                recon_ref, head_ref):
    x = x_ref[...]                                   # [TB, IN_PAD]  bf16
    eps = eps_ref[...].astype(jnp.float32)           # [TB, LAT_PAD] (bf16 input)

    # ---- encode ----
    h1 = jnp.dot(x, w1_ref[...], preferred_element_type=jnp.float32) + b1_ref[...]
    h1 = jnp.maximum(h1, 0.0)                        # ReLU; dropout = identity (eval)

    # fused mu/logvar head: one [TB, HID_PAD] x [HID_PAD, 2*LAT_PAD] matmul
    head = jnp.dot(h1.astype(jnp.bfloat16), w2_ref[...],
                   preferred_element_type=jnp.float32) + b2_ref[...]
    mu = head[:, :LAT_PAD]                           # real data in lanes 0:20, rest exactly 0
    logvar = head[:, LAT_PAD:]                       # real data in lanes 0:20, rest exactly 0

    # ---- reparameterize ----
    std = jnp.exp(0.5 * logvar)
    z = mu + eps * std

    # ---- decode ----
    h3 = jnp.dot(z.astype(jnp.bfloat16), w3_ref[...],
                 preferred_element_type=jnp.float32) + b3_ref[...]
    h3 = jnp.maximum(h3, 0.0)                        # ReLU; dropout = identity (eval)
    logits = jnp.dot(h3.astype(jnp.bfloat16), w4_ref[...],
                     preferred_element_type=jnp.float32) + b4_ref[...]
    recon = jax.nn.sigmoid(logits)

    # bf16 writeback halves the dominant recon HBM traffic (lane-dense, full-width).
    recon_ref[...] = recon.astype(jnp.bfloat16)

    # Pack mu (lanes 0:LATENT_DIM) and logvar (lanes LATENT_DIM:2*LATENT_DIM) into
    # one lane-dense 128-wide f32 block. Padded lanes of mu/logvar are exactly zero
    # (zero-padded weight columns / bias), so mu + roll(logvar, LATENT_DIM) is an
    # exact pack; the roll runs on the XLU (free slot).
    head_ref[...] = mu + pltpu.roll(logvar, shift=LATENT_DIM, axis=1)


def vae_forward(x, eps, params, *, tb=512):
    """x: [B, 784] f32, eps: [B, latent] f32, params: padded bf16/f32 dict.

    Returns (recon bf16 [B, 784], mu f32 [B, 20], logvar f32 [B, 20]).
    """
    B = x.shape[0]
    Bp8 = _round_up(B, 8)
    # Number of batch tiles: enough to cover Bp8 at <= tb rows each, and at least
    # 2 when the batch allows so the "parallel" axis shards across both v7x TCs.
    ntiles = max(1, -(-Bp8 // max(tb, 8)))
    if Bp8 >= 16:
        ntiles = max(ntiles, 2)
    TB = _round_up(-(-Bp8 // ntiles), 8)             # batch tile, multiple of 8
    Bp = TB * ntiles

    # Single fused padding pass per input (no second Bp-pad copy).
    xp = jnp.zeros((Bp, IN_PAD), jnp.bfloat16).at[:B, :IN_DIM].set(
        x.astype(jnp.bfloat16))
    epsp = jnp.zeros((Bp, LAT_PAD), jnp.bfloat16).at[:B, :LATENT_DIM].set(
        eps.astype(jnp.bfloat16))

    grid = (ntiles,)

    def row_spec(cols):
        return pl.BlockSpec((TB, cols), lambda i: (i, 0))

    def full_spec(arr):
        # constant index_map -> weight/bias stays resident in VMEM across tiles
        return pl.BlockSpec(arr.shape, lambda i: (0, 0))

    args = (xp, epsp,
            params["w1"], params["b1"],
            params["w2"], params["b2"],
            params["w3"], params["b3"],
            params["w4"], params["b4"])
    in_specs = [row_spec(IN_PAD), row_spec(LAT_PAD)] + [full_spec(a) for a in args[2:]]
    out_shape = (
        jax.ShapeDtypeStruct((Bp, IN_PAD), jnp.bfloat16),   # recon (padded, bf16)
        jax.ShapeDtypeStruct((Bp, LAT_PAD), jnp.float32),   # packed [mu | logvar | 0...]
    )
    out_specs = (row_spec(IN_PAD), row_spec(LAT_PAD))

    recon_p, head_p = pl.pallas_call(
        _vae_kernel,
        grid=grid,
        out_shape=out_shape,
        in_specs=in_specs,
        out_specs=out_specs,
        compiler_params=pltpu.CompilerParams(
            dimension_semantics=("parallel",),
            vmem_limit_bytes=32 << 20,               # tb=512 footprint ~9 MiB
        ),
    )(*args)

    recon = recon_p[:B, :IN_DIM]                             # bf16
    mu = head_p[:B, :LATENT_DIM]                             # f32
    logvar = head_p[:B, LATENT_DIM:2 * LATENT_DIM]           # f32
    return recon, mu, logvar


def vae_reference(x, eps, params):
    """Pure-JAX reference mirroring the kernel's bf16 casts exactly."""
    B = x.shape[0]
    xp = jnp.zeros((B, IN_PAD), jnp.bfloat16).at[:, :IN_DIM].set(
        x.astype(jnp.bfloat16))
    epsp = jnp.zeros((B, LAT_PAD), jnp.float32).at[:, :LATENT_DIM].set(
        eps.astype(jnp.bfloat16).astype(jnp.float32))
    dot = lambda a, b: jnp.dot(a, b, preferred_element_type=jnp.float32)
    h1 = jnp.maximum(dot(xp, params["w1"]) + params["b1"], 0.0)
    head = dot(h1.astype(jnp.bfloat16), params["w2"]) + params["b2"]
    mu_p, logvar_p = head[:, :LAT_PAD], head[:, LAT_PAD:]
    z = mu_p + epsp * jnp.exp(0.5 * logvar_p)
    h3 = jnp.maximum(dot(z.astype(jnp.bfloat16), params["w3"]) + params["b3"], 0.0)
    recon_p = jax.nn.sigmoid(dot(h3.astype(jnp.bfloat16), params["w4"]) + params["b4"])
    return recon_p[:, :IN_DIM], mu_p[:, :LATENT_DIM], logvar_p[:, :LATENT_DIM]


def init_params(key):
    """PyTorch-like uniform fan-in init, stored padded: W as [in_pad, out_pad]
    (x @ W == nn.Linear), weights bf16, biases f32 [1, out_pad]."""
    def linear(key, fan_in, fan_out, in_pad, out_pad):
        kw, kb = jax.random.split(key)
        bound = 1.0 / jnp.sqrt(fan_in)
        w = jax.random.uniform(kw, (fan_in, fan_out), jnp.float32, -bound, bound)
        b = jax.random.uniform(kb, (fan_out,), jnp.float32, -bound, bound)
        wp = jnp.zeros((in_pad, out_pad), jnp.float32).at[:fan_in, :fan_out].set(w)
        bp = jnp.zeros((1, out_pad), jnp.float32).at[0, :fan_out].set(b)
        return wp, bp

    keys = jax.random.split(key, 5)
    w1, b1 = linear(keys[0], IN_DIM, HID_DIM, IN_PAD, HID_PAD)
    w2m, b2m = linear(keys[1], HID_DIM, LATENT_DIM, HID_PAD, LAT_PAD)
    w2l, b2l = linear(keys[2], HID_DIM, LATENT_DIM, HID_PAD, LAT_PAD)
    w3, b3 = linear(keys[3], LATENT_DIM, HID_DIM, LAT_PAD, HID_PAD)
    w4, b4 = linear(keys[4], HID_DIM, IN_DIM, HID_PAD, IN_PAD)

    # fuse the two encoder heads into one lane-dense [HID_PAD, 256] matmul
    w2 = jnp.concatenate([w2m, w2l], axis=1)
    b2 = jnp.concatenate([b2m, b2l], axis=1)

    bf16 = lambda a: a.astype(jnp.bfloat16)
    return {
        "w1": bf16(w1), "b1": b1,
        "w2": bf16(w2), "b2": b2,
        "w3": bf16(w3), "b3": b3,
        "w4": bf16(w4), "b4": b4,
    }


if __name__ == "__main__":
    key = jax.random.PRNGKey(0)
    k_params, k_x, k_eps = jax.random.split(key, 3)

    B = 2
    params = init_params(k_params)
    # MNIST-like input, flattened to [B, 784] in [0, 1)
    x = jax.random.uniform(k_x, (B, IN_DIM), jnp.float32)
    # eps ~ N(0, 1) generated outside the kernel (glue), consumed inside it
    eps = jax.random.normal(k_eps, (B, LATENT_DIM), jnp.float32)

    recon, mu, logvar = vae_forward(x, eps, params)
    jax.block_until_ready((recon, mu, logvar))

    recon_r, mu_r, logvar_r = vae_reference(x, eps, params)

    assert recon.shape == (B, IN_DIM)
    assert recon.dtype == jnp.bfloat16
    assert mu.shape == (B, LATENT_DIM)
    assert logvar.shape == (B, LATENT_DIM)

    recon_f32 = recon.astype(jnp.float32)
    assert bool(jnp.all(jnp.isfinite(recon_f32)))
    assert bool(jnp.all((recon_f32 >= 0.0) & (recon_f32 <= 1.0)))
    assert bool(jnp.allclose(recon_f32, recon_r, atol=5e-3, rtol=5e-3))
    assert bool(jnp.allclose(mu, mu_r, atol=2e-3, rtol=2e-3))
    assert bool(jnp.allclose(logvar, logvar_r, atol=2e-3, rtol=2e-3))

    print("KERNEL_OK")
</pallas_src>

<mosaic_0001>
module attributes {stable_mosaic.version = 11 : i64} {
  func.func @_vae_kernel(%arg0: i32, %arg1: memref<8x896xbf16, #tpu.memory_space<vmem>>, %arg2: memref<8x128xbf16, #tpu.memory_space<vmem>>, %arg3: memref<896x512xbf16, #tpu.memory_space<vmem>>, %arg4: memref<1x512xf32, #tpu.memory_space<vmem>>, %arg5: memref<512x256xbf16, #tpu.memory_space<vmem>>, %arg6: memref<1x256xf32, #tpu.memory_space<vmem>>, %arg7: memref<128x512xbf16, #tpu.memory_space<vmem>>, %arg8: memref<1x512xf32, #tpu.memory_space<vmem>>, %arg9: memref<512x896xbf16, #tpu.memory_space<vmem>>, %arg10: memref<1x896xf32, #tpu.memory_space<vmem>>, %arg11: memref<8x896xbf16, #tpu.memory_space<vmem>>, %arg12: memref<8x128xf32, #tpu.memory_space<vmem>>) attributes {dimension_semantics = [#tpu.dimension_semantics<parallel>], iteration_bounds = array<i64: 1>, scalar_prefetch = 0 : i64, scratch_operands = 0 : i64, tpu.core_type = #tpu.core_type<tc>, window_params = [{transform_indices = @transform_0, window_bounds = array<i64: 8, 896>}, {transform_indices = @transform_1, window_bounds = array<i64: 8, 128>}, {pipeline_mode = #tpu.pipeline_mode<synchronous>, transform_indices = @transform_2, window_bounds = array<i64: 896, 512>}, {pipeline_mode = #tpu.pipeline_mode<synchronous>, transform_indices = @transform_3, window_bounds = array<i64: 1, 512>}, {pipeline_mode = #tpu.pipeline_mode<synchronous>, transform_indices = @transform_4, window_bounds = array<i64: 512, 256>}, {pipeline_mode = #tpu.pipeline_mode<synchronous>, transform_indices = @transform_5, window_bounds = array<i64: 1, 256>}, {pipeline_mode = #tpu.pipeline_mode<synchronous>, transform_indices = @transform_6, window_bounds = array<i64: 128, 512>}, {pipeline_mode = #tpu.pipeline_mode<synchronous>, transform_indices = @transform_7, window_bounds = array<i64: 1, 512>}, {pipeline_mode = #tpu.pipeline_mode<synchronous>, transform_indices = @transform_8, window_bounds = array<i64: 512, 896>}, {pipeline_mode = #tpu.pipeline_mode<synchronous>, transform_indices = @transform_9, window_bounds = array<i64: 1, 896>}, {transform_indices = @transform_10, window_bounds = array<i64: 8, 896>}, {transform_indices = @transform_11, window_bounds = array<i64: 8, 128>}]} {
    %c0 = arith.constant 0 : index
    %c0_0 = arith.constant 0 : index
    %0 = vector.load %arg1[%c0, %c0_0] : memref<8x896xbf16, #tpu.memory_space<vmem>>, vector<8x896xbf16>
    %c0_1 = arith.constant 0 : index
    %c0_2 = arith.constant 0 : index
    %1 = vector.load %arg2[%c0_1, %c0_2] : memref<8x128xbf16, #tpu.memory_space<vmem>>, vector<8x128xbf16>
    %2 = arith.extf %1 : vector<8x128xbf16> to vector<8x128xf32>
    %c0_3 = arith.constant 0 : index
    %c0_4 = arith.constant 0 : index
    %3 = vector.load %arg3[%c0_3, %c0_4] : memref<896x512xbf16, #tpu.memory_space<vmem>>, vector<896x512xbf16>
    %cst = arith.constant dense<0.000000e+00> : vector<8x512xf32>
    %4 = tpu.matmul %0, %3, %cst {dimension_numbers = #tpu.dot_dimension_numbers<[1], [0], [0], [1], [0, 0, 1, 1], [], []>} : vector<8x896xbf16>, vector<896x512xbf16>, vector<8x512xf32> -> vector<8x512xf32>
    %c0_5 = arith.constant 0 : index
    %c0_6 = arith.constant 0 : index
    %5 = vector.load %arg4[%c0_5, %c0_6] : memref<1x512xf32, #tpu.memory_space<vmem>>, vector<1x512xf32>
    %6 = vector.broadcast %5 : vector<1x512xf32> to vector<8x512xf32>
    %7 = arith.addf %4, %6 : vector<8x512xf32>
    %cst_7 = arith.constant 0.000000e+00 : f32
    %8 = vector.broadcast %cst_7 : f32 to vector<8x512xf32>
    %9 = arith.maximumf %7, %8 : vector<8x512xf32>
    %10 = arith.truncf %9 : vector<8x512xf32> to vector<8x512xbf16>
    %c0_8 = arith.constant 0 : index
    %c0_9 = arith.constant 0 : index
    %11 = vector.load %arg5[%c0_8, %c0_9] : memref<512x256xbf16, #tpu.memory_space<vmem>>, vector<512x256xbf16>
    %cst_10 = arith.constant dense<0.000000e+00> : vector<8x256xf32>
    %12 = tpu.matmul %10, %11, %cst_10 {dimension_numbers = #tpu.dot_dimension_numbers<[1], [0], [0], [1], [0, 0, 1, 1], [], []>} : vector<8x512xbf16>, vector<512x256xbf16>, vector<8x256xf32> -> vector<8x256xf32>
    %c0_11 = arith.constant 0 : index
    %c0_12 = arith.constant 0 : index
    %13 = vector.load %arg6[%c0_11, %c0_12] : memref<1x256xf32, #tpu.memory_space<vmem>>, vector<1x256xf32>
    %14 = vector.broadcast %13 : vector<1x256xf32> to vector<8x256xf32>
    %15 = arith.addf %12, %14 : vector<8x256xf32>
    %16 = vector.extract_strided_slice %15 {offsets = [0, 0], sizes = [8, 128], strides = [1, 1]} : vector<8x256xf32> to vector<8x128xf32>
    %17 = vector.extract_strided_slice %15 {offsets = [0, 128], sizes = [8, 128], strides = [1, 1]} : vector<8x256xf32> to vector<8x128xf32>
    %cst_13 = arith.constant 5.000000e-01 : f32
    %18 = vector.broadcast %cst_13 : f32 to vector<8x128xf32>
    %19 = arith.mulf %18, %17 : vector<8x128xf32>
    %20 = math.exp %19 : vector<8x128xf32>
    %21 = arith.mulf %2, %20 : vector<8x128xf32>
    %22 = arith.addf %16, %21 : vector<8x128xf32>
    %23 = arith.truncf %22 : vector<8x128xf32> to vector<8x128xbf16>
    %c0_14 = arith.constant 0 : index
    %c0_15 = arith.constant 0 : index
    %24 = vector.load %arg7[%c0_14, %c0_15] : memref<128x512xbf16, #tpu.memory_space<vmem>>, vector<128x512xbf16>
    %cst_16 = arith.constant dense<0.000000e+00> : vector<8x512xf32>
    %25 = tpu.matmul %23, %24, %cst_16 {dimension_numbers = #tpu.dot_dimension_numbers<[1], [0], [0], [1], [0, 0, 1, 1], [], []>} : vector<8x128xbf16>, vector<128x512xbf16>, vector<8x512xf32> -> vector<8x512xf32>
    %c0_17 = arith.constant 0 : index
    %c0_18 = arith.constant 0 : index
    %26 = vector.load %arg8[%c0_17, %c0_18] : memref<1x512xf32, #tpu.memory_space<vmem>>, vector<1x512xf32>
    %27 = vector.broadcast %26 : vector<1x512xf32> to vector<8x512xf32>
    %28 = arith.addf %25, %27 : vector<8x512xf32>
    %cst_19 = arith.constant 0.000000e+00 : f32
    %29 = vector.broadcast %cst_19 : f32 to vector<8x512xf32>
    %30 = arith.maximumf %28, %29 : vector<8x512xf32>
    %31 = arith.truncf %30 : vector<8x512xf32> to vector<8x512xbf16>
    %c0_20 = arith.constant 0 : index
    %c0_21 = arith.constant 0 : index
    %32 = vector.load %arg9[%c0_20, %c0_21] : memref<512x896xbf16, #tpu.memory_space<vmem>>, vector<512x896xbf16>
    %cst_22 = arith.constant dense<0.000000e+00> : vector<8x896xf32>
    %33 = tpu.matmul %31, %32, %cst_22 {dimension_numbers = #tpu.dot_dimension_numbers<[1], [0], [0], [1], [0, 0, 1, 1], [], []>} : vector<8x512xbf16>, vector<512x896xbf16>, vector<8x896xf32> -> vector<8x896xf32>
    %c0_23 = arith.constant 0 : index
    %c0_24 = arith.constant 0 : index
    %34 = vector.load %arg10[%c0_23, %c0_24] : memref<1x896xf32, #tpu.memory_space<vmem>>, vector<1x896xf32>
    %35 = vector.broadcast %34 : vector<1x896xf32> to vector<8x896xf32>
    %36 = arith.addf %33, %35 : vector<8x896xf32>
    %37 = arith.negf %36 : vector<8x896xf32>
    %38 = math.exp %37 : vector<8x896xf32>
    %cst_25 = arith.constant 1.000000e+00 : f32
    %39 = vector.broadcast %cst_25 : f32 to vector<8x896xf32>
    %40 = arith.addf %39, %38 : vector<8x896xf32>
    %41 = arith.divf %39, %40 : vector<8x896xf32>
    %42 = arith.truncf %41 : vector<8x896xf32> to vector<8x896xbf16>
    %c0_26 = arith.constant 0 : index
    %c0_27 = arith.constant 0 : index
    %43 = vector.load %arg11[%c0_26, %c0_27] : memref<8x896xbf16, #tpu.memory_space<vmem>>, vector<8x896xbf16>
    tpu.vector_store %arg11[%c0_26, %c0_27], %42 {strides = array<i32>} : memref<8x896xbf16, #tpu.memory_space<vmem>>, vector<8x896xbf16>,
    %c20_i32 = arith.constant 20 : i32
    %44 = tpu.dynamic_rotate %17 by %c20_i32 dim 1 : vector<8x128xf32>, i32 -> vector<8x128xf32>
    %45 = arith.addf %16, %44 : vector<8x128xf32>
    %c0_28 = arith.constant 0 : index
    %c0_29 = arith.constant 0 : index
    %46 = vector.load %arg12[%c0_28, %c0_29] : memref<8x128xf32, #tpu.memory_space<vmem>>, vector<8x128xf32>
    tpu.vector_store %arg12[%c0_28, %c0_29], %45 {strides = array<i32>} : memref<8x128xf32, #tpu.memory_space<vmem>>, vector<8x128xf32>,
    return
  }
  func.func @transform_0(%arg0: i32) -> (i32, i32) {
    %c0_i32 = arith.constant 0 : i32
    %c0_i32_0 = arith.constant 0 : i32
    return %arg0, %c0_i32 : i32, i32
  }
  func.func @transform_1(%arg0: i32) -> (i32, i32) {
    %c0_i32 = arith.constant 0 : i32
    %c0_i32_0 = arith.constant 0 : i32
    return %arg0, %c0_i32 : i32, i32
  }
  func.func @transform_2(%arg0: i32) -> (i32, i32) {
    %c0_i32 = arith.constant 0 : i32
    %c0_i32_0 = arith.constant 0 : i32
    %c0_i32_1 = arith.constant 0 : i32
    return %c0_i32, %c0_i32_0 : i32, i32
  }
  func.func @transform_3(%arg0: i32) -> (i32, i32) {
    %c0_i32 = arith.constant 0 : i32
    %c0_i32_0 = arith.constant 0 : i32
    %c0_i32_1 = arith.constant 0 : i32
    return %c0_i32, %c0_i32_0 : i32, i32
  }
  func.func @transform_4(%arg0: i32) -> (i32, i32) {
    %c0_i32 = arith.constant 0 : i32
    %c0_i32_0 = arith.constant 0 : i32
    %c0_i32_1 = arith.constant 0 : i32
    return %c0_i32, %c0_i32_0 : i32, i32
  }
  func.func @transform_5(%arg0: i32) -> (i32, i32) {
    %c0_i32 = arith.constant 0 : i32
    %c0_i32_0 = arith.constant 0 : i32
    %c0_i32_1 = arith.constant 0 : i32
    return %c0_i32, %c0_i32_0 : i32, i32
  }
  func.func @transform_6(%arg0: i32) -> (i32, i32) {
    %c0_i32 = arith.constant 0 : i32
    %c0_i32_0 = arith.constant 0 : i32
    %c0_i32_1 = arith.constant 0 : i32
    return %c0_i32, %c0_i32_0 : i32, i32
  }
  func.func @transform_7(%arg0: i32) -> (i32, i32) {
    %c0_i32 = arith.constant 0 : i32
    %c0_i32_0 = arith.constant 0 : i32
    %c0_i32_1 = arith.constant 0 : i32
    return %c0_i32, %c0_i32_0 : i32, i32
  }
  func.func @transform_8(%arg0: i32) -> (i32, i32) {
    %c0_i32 = arith.constant 0 : i32
    %c0_i32_0 = arith.constant 0 : i32
    %c0_i32_1 = arith.constant 0 : i32
    return %c0_i32, %c0_i32_0 : i32, i32
  }
  func.func @transform_9(%arg0: i32) -> (i32, i32) {
    %c0_i32 = arith.constant 0 : i32
    %c0_i32_0 = arith.constant 0 : i32
    %c0_i32_1 = arith.constant 0 : i32
    return %c0_i32, %c0_i32_0 : i32, i32
  }
  func.func @transform_10(%arg0: i32) -> (i32, i32) {
    %c0_i32 = arith.constant 0 : i32
    %c0_i32_0 = arith.constant 0 : i32
    return %arg0, %c0_i32 : i32, i32
  }
  func.func @transform_11(%arg0: i32) -> (i32, i32) {
    %c0_i32 = arith.constant 0 : i32
    %c0_i32_0 = arith.constant 0 : i32
    return %arg0, %c0_i32 : i32, i32
  }
}

</mosaic_0001>

<bundles_post_ra>
// kernel: tpu_custom_call.1
= control target key start
LH: loop header
LB: loop body
LE: loop exit
PB: predicated region body
PF: predicated region fallthrough
CT: control target
= control target key end

     0   :  { %17 = vsyncpa [#allocation3], 0  ;;  %s6531_s0 = inlined_call_operand.hbm [shape: bf16[8,896], index: 0, kind: input, shape index: {}]   ;;  %s6532_s1 = inlined_call_operand.hbm [shape: bf16[8,128], index: 1, kind: input, shape index: {}]   ;;  %s6533_s2 = inlined_call_operand.hbm [shape: bf16[896,512], index: 2, kind: input, shape index: {}]   ;;  %s6534_s3 = inlined_call_operand.vmem [shape: f32[1,512], index: 3, kind: input, shape index: {}]   ;;  %s6535_s4 = inlined_call_operand.hbm [shape: bf16[512,256], index: 4, kind: input, shape index: {}]   ;;  %s6536_s5 = inlined_call_operand.vmem [shape: f32[1,256], index: 5, kind: input, shape index: {}]   ;;  %s6537_s6 = inlined_call_operand.hbm [shape: bf16[128,512], index: 6, kind: input, shape index: {}]   ;;  %s6538_s7 = inlined_call_operand.vmem [shape: f32[1,512], index: 7, kind: input, shape index: {}]   ;;  %s6539_s8 = inlined_call_operand.hbm [shape: bf16[512,896], index: 8, kind: input, shape index: {}]   ;;  %s6540_s9 = inlined_call_operand.vmem [shape: f32[1,896], index: 9, kind: input, shape index: {}]   ;;  %s6541_s10 = inlined_call_operand.hbm [shape: bf16[8,896], index: 10, kind: output, shape index: {0}]   ;;  %s6542_s11 = inlined_call_operand.hbm [shape: f32[8,128], index: 11, kind: output, shape index: {1}]  }
   0x1   :  { %18 = vsyncpa [#allocation6], 0 }
   0x2   :  { %19 = vsyncpa [#allocation9], 0 }
   0x3   :  { %20 = vsyncpa [#allocation12], 0 }
   0x4   :  { %21 = vsyncpa [#allocation4], 0 }
   0x5   :  { %22 = vsyncpa [#allocation15], 0  ;;  %s6224_s17 = smov [#allocation5]   ;;  %s6225_s19 = smov [#allocation8]  }
   0x6   :  { %s39_s18 = sshll.u32 %s6224_s17, 4  ;;  %s62_s20 = sshll.u32 %s6225_s19, 4  ;;  %s40_s18 = int_to_ptr.vmem [resolvable:$true] %s39_s18  ;;  %s6300_s20 = int_to_ptr.vmem [resolvable:$true] %s62_s20 }
   0x7   :  { %s6036_s23 = scalar_lea.hbm %s6532_s1, 64 }
   0x8   :  { %p6037_p0 = scmp.ne.s32.totalorder %s6532_s1, %s6036_s23  ;;  %p6040_p1 = scmp.lt.u32.totalorder %s6036_s23, %s6532_s1 }
   0xa   :  { %p6042_p2 = pnand %p6040_p1, %p6037_p0 }
   0xc   :  { %6045 = shalt.err (!%p6042_p2)
}
   0xd   :  { %s6046_s28 = scalar_lea.vmem %s40_s18, 64  ;;  %p6051_p4 = scmp.lt.s32.totalorder %s40_s18, %s40_s18 }
   0xe   :  { %p6047_p3 = scmp.ne.s32.totalorder %s40_s18, %s6046_s28  ;;  %p6052_p5 = scmp.lt.s32.totalorder %s6046_s28, %s6046_s28 }
  0x10   :  { %p6053_p6 = por %p6052_p5, %p6051_p4 }
  0x12   :  { %p6054_p7 = pnand %p6053_p6, %p6047_p3 }
  0x14   :  { %6057 = shalt.err (!%p6054_p7)
}
  0x15   :  { %42 = dma.hbm_to_vmem [thread:$0]  %s6532_s1, 64, %s40_s18, [#allocation6]  }
  0x16   :  { %s6058_s14 = scalar_lea.hbm %s6535_s4, 8192 }
  0x17   :  { %p6059_p8 = scmp.ne.s32.totalorder %s6535_s4, %s6058_s14  ;;  %p6062_p9 = scmp.lt.u32.totalorder %s6058_s14, %s6535_s4 }
  0x19   :  { %p6064_p10 = pnand %p6062_p9, %p6059_p8 }
  0x1b   :  { %6067 = shalt.err (!%p6064_p10)
}
  0x1c   :  { %s6068_s21 = scalar_lea.vmem %s6300_s20, 8192  ;;  %p6073_p12 = scmp.lt.s32.totalorder %s6300_s20, %s6300_s20 }
  0x1d   :  { %p6069_p11 = scmp.ne.s32.totalorder %s6300_s20, %s6068_s21  ;;  %p6074_p13 = scmp.lt.s32.totalorder %s6068_s21, %s6068_s21 }
  0x1f   :  { %p6075_p0 = por %p6074_p13, %p6073_p12 }
  0x21   :  { %p6076_p1 = pnand %p6075_p0, %p6069_p11 }
  0x23   :  { %6079 = shalt.err (!%p6076_p1)
}
  0x24   :  { %s6226_s1 = smov 128   ;;  %s6227_s18 = smov 8  }
  0x25   :  { %68 = dma.hbm_to_vmem [thread:$0]  %s6535_s4, 8192, %s6300_s20, [#allocation9], %s6226_s1, %s6226_s1, %s6227_s18  }
  0x26   :  { %s6228_s24 = smov [#allocation2]   ;;  %s6229_s26 = smov [#allocation7]  }
  0x27   :  { %s29_s25 = sshll.u32 %s6228_s24, 4  ;;  %s48_s27 = sshll.u32 %s6229_s26, 4  ;;  %s30_s25 = int_to_ptr.vmem [resolvable:$true] %s29_s25  ;;  %s6331_s27 = int_to_ptr.vmem [resolvable:$true] %s48_s27 }
  0x28   :  { %s6080_s30 = scalar_lea.hbm %s6531_s0, 448 }
  0x29   :  { %p6081_p2 = scmp.ne.s32.totalorder %s6531_s0, %s6080_s30  ;;  %p6084_p3 = scmp.lt.u32.totalorder %s6080_s30, %s6531_s0 }
  0x2b   :  { %p6086_p4 = pnand %p6084_p3, %p6081_p2 }
  0x2d   :  { %6089 = shalt.err (!%p6086_p4)
}
  0x2e   :  { %s6090_s4 = scalar_lea.vmem %s30_s25, 448  ;;  %p6095_p6 = scmp.lt.s32.totalorder %s30_s25, %s30_s25 }
  0x2f   :  { %p6091_p5 = scmp.ne.s32.totalorder %s30_s25, %s6090_s4  ;;  %p6096_p7 = scmp.lt.s32.totalorder %s6090_s4, %s6090_s4 }
  0x31   :  { %p6097_p8 = por %p6096_p7, %p6095_p6 }
  0x33   :  { %p6098_p9 = pnand %p6097_p8, %p6091_p5 }
  0x35   :  { %6101 = shalt.err (!%p6098_p9)
}
  0x36   :  { %32 = dma.hbm_to_vmem [thread:$0]  %s6531_s0, 448, %s30_s25, [#allocation3]  }
  0x37   :  { %s6102_s21 = scalar_lea.hbm %s6533_s2, 28672 }
  0x38   :  { %p6103_p10 = scmp.ne.s32.totalorder %s6533_s2, %s6102_s21  ;;  %p6106_p11 = scmp.lt.u32.totalorder %s6102_s21, %s6533_s2 }
  0x3a   :  { %p6108_p12 = pnand %p6106_p11, %p6103_p10 }
  0x3c   :  { %6111 = shalt.err (!%p6108_p12)
}
  0x3d   :  { %s6112_s24 = scalar_lea.vmem %s6331_s27, 28672  ;;  %p6117_p0 = scmp.lt.s32.totalorder %s6331_s27, %s6331_s27 }
  0x3e   :  { %p6113_p13 = scmp.ne.s32.totalorder %s6331_s27, %s6112_s24  ;;  %p6118_p1 = scmp.lt.s32.totalorder %s6112_s24, %s6112_s24 }
  0x40   :  { %p6119_p2 = por %p6118_p1, %p6117_p0 }
  0x42   :  { %p6120_p3 = pnand %p6119_p2, %p6113_p13 }
  0x44   :  { %6123 = shalt.err (!%p6120_p3)
}
  0x45   :  { %s6230_s0 = smov 256   ;;  %s6231_s25 = smov 16  }
  0x46   :  { %54 = dma.hbm_to_vmem [thread:$0]  %s6533_s2, 28672, %s6331_s27, [#allocation6], %s6230_s0, %s6230_s0, %s6231_s25  }
  0x47   :  { %s6232_s29 = smov [#allocation10]   ;;  %s6233_s12 = smov [#allocation11]  }
  0x48   :  { %s76_s30 = sshll.u32 %s6232_s29, 4  ;;  %s90_s13 = sshll.u32 %s6233_s12, 4  ;;  %s77_s30 = int_to_ptr.vmem [resolvable:$true] %s76_s30  ;;  %s6362_s13 = int_to_ptr.vmem [resolvable:$true] %s90_s13 }
  0x49   :  { %s6124_s4 = scalar_lea.hbm %s6537_s6, 4096 }
  0x4a   :  { %p6125_p4 = scmp.ne.s32.totalorder %s6537_s6, %s6124_s4  ;;  %p6128_p5 = scmp.lt.u32.totalorder %s6124_s4, %s6537_s6 }
  0x4c   :  { %p6130_p6 = pnand %p6128_p5, %p6125_p4 }
  0x4e   :  { %6133 = shalt.err (!%p6130_p6)
}
  0x4f   :  { %s6134_s2 = scalar_lea.vmem %s77_s30, 4096  ;;  %p6139_p8 = scmp.lt.s32.totalorder %s77_s30, %s77_s30 }
  0x50   :  { %p6135_p7 = scmp.ne.s32.totalorder %s77_s30, %s6134_s2  ;;  %p6140_p9 = scmp.lt.s32.totalorder %s6134_s2, %s6134_s2 }
  0x52   :  { %p6141_p10 = por %p6140_p9, %p6139_p8 }
  0x54   :  { %p6142_p11 = pnand %p6141_p10, %p6135_p7 }
  0x56   :  { %6145 = shalt.err (!%p6142_p11)
}
  0x57   :  { %82 = dma.hbm_to_vmem [thread:$0]  %s6537_s6, 4096, %s77_s30, [#allocation9], %s6230_s0, %s6230_s0, %s6231_s25  }
  0x58   :  { %s6146_s22 = scalar_lea.hbm %s6539_s8, 28672 }
  0x59   :  { %p6147_p12 = scmp.ne.s32.totalorder %s6539_s8, %s6146_s22  ;;  %p6150_p13 = scmp.lt.u32.totalorder %s6146_s22, %s6539_s8 }
  0x5b   :  { %p6152_p0 = pnand %p6150_p13, %p6147_p12 }
  0x5d   :  { %6155 = shalt.err (!%p6152_p0)
}
  0x5e   :  { %s6156_s29 = scalar_lea.vmem %s6362_s13, 28672  ;;  %p6161_p2 = scmp.lt.s32.totalorder %s6362_s13, %s6362_s13 }
  0x5f   :  { %p6157_p1 = scmp.ne.s32.totalorder %s6362_s13, %s6156_s29  ;;  %p6162_p3 = scmp.lt.s32.totalorder %s6156_s29, %s6156_s29 }
  0x61   :  { %p6163_p4 = por %p6162_p3, %p6161_p2 }
  0x63   :  { %p6164_p5 = pnand %p6163_p4, %p6157_p1 }
  0x65   :  { %6167 = shalt.err (!%p6164_p5)
}
  0x66   :  { %s6234_s6 = smov 448   ;;  %s6235_s0 = smov 28  }
  0x67   :  { %96 = dma.hbm_to_vmem [thread:$0]  %s6539_s8, 28672, %s6362_s13, [#allocation12], %s6234_s6, %s6234_s6, %s6235_s0  }
  0x68   :  { %6212 = dma.done.wait [#allocation3], 448  }
  0x69   :  { %6213 = vsyncadd [#allocation3], 4294966848 }
  0x6a   :  { %6214 = dma.done.wait [#allocation6], 28736  }
  0x6b   :  { %6215 = vsyncadd [#allocation6], 4294938560 }
  0x6c   :  { %6216 = dma.done.wait [#allocation9], 12288  }
  0x6d   :  { %6217 = vsyncadd [#allocation9], 4294955008 }
  0x6e   :  { %6218 = dma.done.wait [#allocation12], 28672  }
  0x6f   :  { %6219 = vsyncadd [#allocation12], 4294938624  ;;  %v5199_v0 = vld [vmem:[#allocation7 + $0x4] ss:$16 sps:$4 sm:$0xff]   ;;  %v5201_v1 = vld [vmem:[#allocation7 + $0xc] ss:$16 sps:$4 sm:$0xff]  }
  0x70   :  { %1515 = vmatprep.subr.bf16.mxu0 %v5199_v0  ;;  %v5203_v2 = vld [vmem:[#allocation7] ss:$16 sps:$4 sm:$0xff]   ;;  %v5204_v3 = vld [vmem:[#allocation7 + $0x8] ss:$16 sps:$4 sm:$0xff]   ;;  %1679 = vmatprep.subr.bf16.mxu1 %v5201_v1  ;;  %v5205_v4 = vld [vmem:[#allocation7 + $0x24] ss:$16 sps:$4 sm:$0xff]  }
  0x71   :  { %1516 = vmatpush1.bf16.msra.mxu0 %v5203_v2  ;;  %1680 = vmatpush1.bf16.msra.mxu1 %v5204_v3  ;;  %v5207_v5 = vld [vmem:[#allocation7 + $0x2c] ss:$16 sps:$4 sm:$0xff]   ;;  %v5209_v6 = vld [vmem:[#allocation7 + $0x20] ss:$16 sps:$4 sm:$0xff]   ;;  %v5210_v7 = vld [vmem:[#allocation7 + $0x28] ss:$16 sps:$4 sm:$0xff]  }
  0x72   :  { %1517 = vmatprep.subr.bf16.mxu0 %v5205_v4  ;;  %1681 = vmatprep.subr.bf16.mxu1 %v5207_v5  ;;  %v5211_v8 = vld [vmem:[#allocation7 + $0x44] ss:$16 sps:$4 sm:$0xff]   ;;  %v5213_v9 = vld [vmem:[#allocation7 + $0x4c] ss:$16 sps:$4 sm:$0xff]   ;;  %v5215_v10 = vld [vmem:[#allocation7 + $0x40] ss:$16 sps:$4 sm:$0xff]  }
  0x73   :  { %v5216_v11 = vld [vmem:[#allocation7 + $0x48] ss:$16 sps:$4 sm:$0xff]   ;;  %v5217_v12 = vld [vmem:[#allocation7 + $0x64] ss:$16 sps:$4 sm:$0xff]   ;;  %v5219_v13 = vld [vmem:[#allocation7 + $0x6c] ss:$16 sps:$4 sm:$0xff]  }
  0x74   :  { %v5221_v14 = vld [vmem:[#allocation7 + $0x60] ss:$16 sps:$4 sm:$0xff]   ;;  %v5222_v15 = vld [vmem:[#allocation7 + $0x68] ss:$16 sps:$4 sm:$0xff]   ;;  %v5223_v16 = vld [vmem:[#allocation7 + $0x84] ss:$16 sps:$4 sm:$0xff]  }
  0x75   :  { %1518 = vmatpush1.bf16.msra.mxu0 %v5209_v6  ;;  %1682 = vmatpush1.bf16.msra.mxu1 %v5210_v7  ;;  %v5225_v17 = vld [vmem:[#allocation7 + $0x8c] ss:$16 sps:$4 sm:$0xff]   ;;  %v5227_v18 = vld [vmem:[#allocation7 + $0x80] ss:$16 sps:$4 sm:$0xff]   ;;  %v5228_v19 = vld [vmem:[#allocation7 + $0x88] ss:$16 sps:$4 sm:$0xff]  }
  0x76   :  { %1519 = vmatprep.subr.bf16.mxu0 %v5211_v8  ;;  %1683 = vmatprep.subr.bf16.mxu1 %v5213_v9  ;;  %v5229_v20 = vld [vmem:[#allocation7 + $0xa4] ss:$16 sps:$4 sm:$0xff]   ;;  %v5231_v21 = vld [vmem:[#allocation7 + $0xac] ss:$16 sps:$4 sm:$0xff]   ;;  %v5233_v22 = vld [vmem:[#allocation7 + $0xa0] ss:$16 sps:$4 sm:$0xff]  }
  0x77   :  { %v5234_v23 = vld [vmem:[#allocation7 + $0xa8] ss:$16 sps:$4 sm:$0xff]   ;;  %v5235_v24 = vld [vmem:[#allocation7 + $0xc4] ss:$16 sps:$4 sm:$0xff]   ;;  %v5237_v25 = vld [vmem:[#allocation7 + $0xcc] ss:$16 sps:$4 sm:$0xff]  }
  0x78   :  { %v5239_v26 = vld [vmem:[#allocation7 + $0xc0] ss:$16 sps:$4 sm:$0xff]   ;;  %v5240_v27 = vld [vmem:[#allocation7 + $0xc8] ss:$16 sps:$4 sm:$0xff]   ;;  %v5241_v28 = vld [vmem:[#allocation7 + $0xe4] ss:$16 sps:$4 sm:$0xff]  }
  0x79   :  { %1520 = vmatpush1.bf16.msra.mxu0 %v5215_v10  ;;  %1684 = vmatpush1.bf16.msra.mxu1 %v5216_v11  ;;  %v5243_v29 = vld [vmem:[#allocation7 + $0xec] ss:$16 sps:$4 sm:$0xff]   ;;  %v5245_v30 = vld [vmem:[#allocation7 + $0xe0] ss:$16 sps:$4 sm:$0xff]   ;;  %v5246_v31 = vld [vmem:[#allocation7 + $0xe8] ss:$16 sps:$4 sm:$0xff]  }
  0x7a   :  { %1521 = vmatprep.subr.bf16.mxu0 %v5217_v12  ;;  %1685 = vmatprep.subr.bf16.mxu1 %v5219_v13  ;;  %v5247_v32 = vld [vmem:[#allocation7 + $0x104] ss:$16 sps:$4 sm:$0xff]   ;;  %v5249_v33 = vld [vmem:[#allocation7 + $0x10c] ss:$16 sps:$4 sm:$0xff]   ;;  %v5251_v34 = vld [vmem:[#allocation7 + $0x100] ss:$16 sps:$4 sm:$0xff]  }
  0x7b   :  { %v5252_v35 = vld [vmem:[#allocation7 + $0x108] ss:$16 sps:$4 sm:$0xff]   ;;  %v5253_v36 = vld [vmem:[#allocation7 + $0x124] ss:$16 sps:$4 sm:$0xff]   ;;  %v5255_v37 = vld [vmem:[#allocation7 + $0x12c] ss:$16 sps:$4 sm:$0xff]  }
  0x7c   :  { %v5257_v38 = vld [vmem:[#allocation7 + $0x120] ss:$16 sps:$4 sm:$0xff]   ;;  %v5258_v39 = vld [vmem:[#allocation7 + $0x128] ss:$16 sps:$4 sm:$0xff]   ;;  %v5259_v40 = vld [vmem:[#allocation7 + $0x144] ss:$16 sps:$4 sm:$0xff]  }
  0x7d   :  { %1522 = vmatpush1.bf16.msra.mxu0 %v5221_v14  ;;  %1686 = vmatpush1.bf16.msra.mxu1 %v5222_v15  ;;  %v5261_v41 = vld [vmem:[#allocation7 + $0x14c] ss:$16 sps:$4 sm:$0xff]   ;;  %v5263_v42 = vld [vmem:[#allocation7 + $0x140] ss:$16 sps:$4 sm:$0xff]   ;;  %v5264_v43 = vld [vmem:[#allocation7 + $0x148] ss:$16 sps:$4 sm:$0xff]  }
  0x7e   :  { %1523 = vmatprep.subr.bf16.mxu0 %v5223_v16  ;;  %1687 = vmatprep.subr.bf16.mxu1 %v5225_v17  ;;  %v5265_v44 = vld [vmem:[#allocation7 + $0x164] ss:$16 sps:$4 sm:$0xff]   ;;  %v5267_v45 = vld [vmem:[#allocation7 + $0x16c] ss:$16 sps:$4 sm:$0xff]   ;;  %v5269_v47 = vld [vmem:[#allocation7 + $0x160] ss:$16 sps:$4 sm:$0xff]  }
  0x7f   :  { %v118_v46 = vld [vmem:[#allocation2] sm:$0xff]  ;;  %v5270_v49 = vld [vmem:[#allocation7 + $0x168] ss:$16 sps:$4 sm:$0xff]   ;;  %v5273_v51 = vld [vmem:[#allocation7 + $0x18c] ss:$16 sps:$4 sm:$0xff]   ;;  %s6237_s14 = smov 20  }
  0x80   :  { %v4522_v48 = vcombine.high %v118_v46, %v118_v46  ;;  %v5271_v50 = vld [vmem:[#allocation7 + $0x184] ss:$16 sps:$4 sm:$0xff]   ;;  %v5275_v52 = vld [vmem:[#allocation7 + $0x180] ss:$16 sps:$4 sm:$0xff]   ;;  %v5276_v53 = vld [vmem:[#allocation7 + $0x188] ss:$16 sps:$4 sm:$0xff]   ;;  %v4521_v4 = vcombine.low %v118_v46, %v118_v46 }
  0x81   :  { %1524 = vmatpush1.bf16.msra.mxu0 %v5227_v18  ;;  %1688 = vmatpush1.bf16.msra.mxu1 %v5228_v19  ;;  %v5277_v54 = vld [vmem:[#allocation7 + $0x1a4] ss:$16 sps:$4 sm:$0xff]   ;;  %v5279_v55 = vld [vmem:[#allocation7 + $0x1ac] ss:$16 sps:$4 sm:$0xff]   ;;  %v5281_v56 = vld [vmem:[#allocation7 + $0x1a0] ss:$16 sps:$4 sm:$0xff]  }
  0x82   :  { %1525 = vmatprep.subr.bf16.mxu0 %v5229_v20  ;;  %1689 = vmatprep.subr.bf16.mxu1 %v5231_v21  ;;  %v5282_v57 = vld [vmem:[#allocation7 + $0x1a8] ss:$16 sps:$4 sm:$0xff]   ;;  %v5283_v58 = vld [vmem:[#allocation7 + $0x1c4] ss:$16 sps:$4 sm:$0xff]   ;;  %v5285_v59 = vld [vmem:[#allocation7 + $0x1cc] ss:$16 sps:$4 sm:$0xff]  }
  0x83   :  { %1547 = vmatprep.mubr.bf16.mxu0 %v4522_v48  ;;  %1711 = vmatprep.mubr.bf16.mxu1 %v4522_v48  ;;  %v5287_v60 = vld [vmem:[#allocation7 + $0x1c0] ss:$16 sps:$4 sm:$0xff]   ;;  %v5288_v61 = vld [vmem:[#allocation7 + $0x1c8] ss:$16 sps:$4 sm:$0xff]   ;;  %v5289_v62 = vld [vmem:[#allocation7 + $0x1e4] ss:$16 sps:$4 sm:$0xff]  }
  0x84   :  { %v5291_v63 = vld [vmem:[#allocation7 + $0x1ec] ss:$16 sps:$4 sm:$0xff]   ;;  %v5293_v0 = vld [vmem:[#allocation7 + $0x1e0] ss:$16 sps:$4 sm:$0xff]   ;;  %v5294_v1 = vld [vmem:[#allocation7 + $0x1e8] ss:$16 sps:$4 sm:$0xff]  }
  0x85   :  { %1526 = vmatpush1.bf16.msra.mxu0 %v5233_v22  ;;  %1690 = vmatpush1.bf16.msra.mxu1 %v5234_v23  ;;  %v5299_v2 = vld [vmem:[#allocation7 + $0x204] ss:$16 sps:$4 sm:$0xff]   ;;  %v5302_v3 = vld [vmem:[#allocation7 + $0x20c] ss:$16 sps:$4 sm:$0xff]   ;;  %v5297_v5 = vld [vmem:[#allocation7 + $0x200] ss:$16 sps:$4 sm:$0xff]  }
  0x86   :  { %1527 = vmatprep.subr.bf16.mxu0 %v5235_v24  ;;  %1691 = vmatprep.subr.bf16.mxu1 %v5237_v25  ;;  %v5300_v6 = vld [vmem:[#allocation7 + $0x208] ss:$16 sps:$4 sm:$0xff]   ;;  %v5305_v7 = vld [vmem:[#allocation7 + $0x224] ss:$16 sps:$4 sm:$0xff]   ;;  %v5308_v8 = vld [vmem:[#allocation7 + $0x22c] ss:$16 sps:$4 sm:$0xff]  }
  0x87   :  { %v5303_v9 = vld [vmem:[#allocation7 + $0x220] ss:$16 sps:$4 sm:$0xff]   ;;  %v5306_v10 = vld [vmem:[#allocation7 + $0x228] ss:$16 sps:$4 sm:$0xff]   ;;  %v5311_v11 = vld [vmem:[#allocation7 + $0x244] ss:$16 sps:$4 sm:$0xff]  }
  0x88   :  { %v5314_v12 = vld [vmem:[#allocation7 + $0x24c] ss:$16 sps:$4 sm:$0xff]   ;;  %v5309_v13 = vld [vmem:[#allocation7 + $0x240] ss:$16 sps:$4 sm:$0xff]   ;;  %v5312_v14 = vld [vmem:[#allocation7 + $0x248] ss:$16 sps:$4 sm:$0xff]  }
  0x89   :  { %1528 = vmatpush1.bf16.msra.mxu0 %v5239_v26  ;;  %1692 = vmatpush1.bf16.msra.mxu1 %v5240_v27  ;;  %v5317_v15 = vld [vmem:[#allocation7 + $0x264] ss:$16 sps:$4 sm:$0xff]   ;;  %v5320_v16 = vld [vmem:[#allocation7 + $0x26c] ss:$16 sps:$4 sm:$0xff]   ;;  %v5315_v17 = vld [vmem:[#allocation7 + $0x260] ss:$16 sps:$4 sm:$0xff]  }
  0x8a   :  { %1529 = vmatprep.subr.bf16.mxu0 %v5241_v28  ;;  %1693 = vmatprep.subr.bf16.mxu1 %v5243_v29  ;;  %v5318_v18 = vld [vmem:[#allocation7 + $0x268] ss:$16 sps:$4 sm:$0xff]   ;;  %v5323_v19 = vld [vmem:[#allocation7 + $0x284] ss:$16 sps:$4 sm:$0xff]   ;;  %v5326_v20 = vld [vmem:[#allocation7 + $0x28c] ss:$16 sps:$4 sm:$0xff]  }
  0x8b   :  { %v5321_v21 = vld [vmem:[#allocation7 + $0x280] ss:$16 sps:$4 sm:$0xff]   ;;  %v5324_v22 = vld [vmem:[#allocation7 + $0x288] ss:$16 sps:$4 sm:$0xff]   ;;  %v5329_v23 = vld [vmem:[#allocation7 + $0x2a4] ss:$16 sps:$4 sm:$0xff]  }
  0x8c   :  { %v5332_v24 = vld [vmem:[#allocation7 + $0x2ac] ss:$16 sps:$4 sm:$0xff]   ;;  %v5327_v25 = vld [vmem:[#allocation7 + $0x2a0] ss:$16 sps:$4 sm:$0xff]   ;;  %v5330_v26 = vld [vmem:[#allocation7 + $0x2a8] ss:$16 sps:$4 sm:$0xff]  }
  0x8d   :  { %1530 = vmatpush1.bf16.msra.mxu0 %v5245_v30  ;;  %1694 = vmatpush1.bf16.msra.mxu1 %v5246_v31  ;;  %v5335_v27 = vld [vmem:[#allocation7 + $0x2c4] ss:$16 sps:$4 sm:$0xff]   ;;  %v5338_v28 = vld [vmem:[#allocation7 + $0x2cc] ss:$16 sps:$4 sm:$0xff]   ;;  %v5333_v31 = vld [vmem:[#allocation7 + $0x2c0] ss:$16 sps:$4 sm:$0xff]  }
  0x8e   :  { %1531 = vmatprep.subr.bf16.mxu0 %v5247_v32  ;;  %1695 = vmatprep.subr.bf16.mxu1 %v5249_v33  ;;  %v6393_v29 = vld [vmem:[#allocation2 + $0x8] sm:$0xff]  ;;  %v5341_v33 = vld [vmem:[#allocation7 + $0x2e4] ss:$16 sps:$4 sm:$0xff]  }
  0x8f   :  { %v4524_v30 = vcombine.high %v6393_v29, %v6393_v29  ;;  %v5336_v32 = vld [vmem:[#allocation7 + $0x2c8] ss:$16 sps:$4 sm:$0xff]   ;;  %v5362_v46 = vld [vmem:[#allocation7 + $0x34c] ss:$16 sps:$4 sm:$0xff]  }
  0x90   :  { %v5360_v48 = vld [vmem:[#allocation7 + $0x348] ss:$16 sps:$4 sm:$0xff]  }
  0x91   :  { %1532 = vmatpush1.bf16.msra.mxu0 %v5251_v34  ;;  %1696 = vmatpush1.bf16.msra.mxu1 %v5252_v35  ;;  %v5344_v34 = vld [vmem:[#allocation7 + $0x2ec] ss:$16 sps:$4 sm:$0xff]   ;;  %v5339_v35 = vld [vmem:[#allocation7 + $0x2e0] ss:$16 sps:$4 sm:$0xff]  }
  0x92   :  { %1533 = vmatprep.subr.bf16.mxu0 %v5253_v36  ;;  %1697 = vmatprep.subr.bf16.mxu1 %v5255_v37  ;;  %v5342_v36 = vld [vmem:[#allocation7 + $0x2e8] ss:$16 sps:$4 sm:$0xff]   ;;  %v5347_v37 = vld [vmem:[#allocation7 + $0x304] ss:$16 sps:$4 sm:$0xff]  }
  0x95   :  { %1534 = vmatpush1.bf16.msra.mxu0 %v5257_v38  ;;  %1698 = vmatpush1.bf16.msra.mxu1 %v5258_v39  ;;  %v5350_v38 = vld [vmem:[#allocation7 + $0x30c] ss:$16 sps:$4 sm:$0xff]   ;;  %v5345_v39 = vld [vmem:[#allocation7 + $0x300] ss:$16 sps:$4 sm:$0xff]  }
  0x96   :  { %1535 = vmatprep.subr.bf16.mxu0 %v5259_v40  ;;  %1699 = vmatprep.subr.bf16.mxu1 %v5261_v41  ;;  %v5348_v40 = vld [vmem:[#allocation7 + $0x308] ss:$16 sps:$4 sm:$0xff]   ;;  %v5353_v41 = vld [vmem:[#allocation7 + $0x324] ss:$16 sps:$4 sm:$0xff]  }
  0x99   :  { %1536 = vmatpush1.bf16.msra.mxu0 %v5263_v42  ;;  %1700 = vmatpush1.bf16.msra.mxu1 %v5264_v43  ;;  %v5356_v42 = vld [vmem:[#allocation7 + $0x32c] ss:$16 sps:$4 sm:$0xff]   ;;  %v5351_v43 = vld [vmem:[#allocation7 + $0x320] ss:$16 sps:$4 sm:$0xff]  }
  0x9a   :  { %1537 = vmatprep.subr.bf16.mxu0 %v5265_v44  ;;  %1701 = vmatprep.subr.bf16.mxu1 %v5267_v45  ;;  %v5354_v44 = vld [vmem:[#allocation7 + $0x328] ss:$16 sps:$4 sm:$0xff]   ;;  %v5359_v45 = vld [vmem:[#allocation7 + $0x344] ss:$16 sps:$4 sm:$0xff]  }
  0x9d   :  { %1538 = vmatpush1.bf16.msra.mxu0 %v5269_v47  ;;  %1702 = vmatpush1.bf16.msra.mxu1 %v5270_v49  ;;  %v5357_v47 = vld [vmem:[#allocation7 + $0x340] ss:$16 sps:$4 sm:$0xff]   ;;  %v5365_v49 = vld [vmem:[#allocation7 + $0x364] ss:$16 sps:$4 sm:$0xff]  }
  0x9e   :  { %1539 = vmatprep.subr.bf16.mxu0 %v5271_v50  ;;  %1703 = vmatprep.subr.bf16.mxu1 %v5273_v51  ;;  %v5368_v50 = vld [vmem:[#allocation7 + $0x36c] ss:$16 sps:$4 sm:$0xff]   ;;  %v5363_v51 = vld [vmem:[#allocation7 + $0x360] ss:$16 sps:$4 sm:$0xff]  }
  0xa1   :  { %1540 = vmatpush1.bf16.msra.mxu0 %v5275_v52  ;;  %1704 = vmatpush1.bf16.msra.mxu1 %v5276_v53  ;;  %v5366_v52 = vld [vmem:[#allocation7 + $0x368] ss:$16 sps:$4 sm:$0xff]   ;;  %v5371_v53 = vld [vmem:[#allocation7 + $0x384] ss:$16 sps:$4 sm:$0xff]  }
  0xa2   :  { %1541 = vmatprep.subr.bf16.mxu0 %v5277_v54  ;;  %1705 = vmatprep.subr.bf16.mxu1 %v5279_v55  ;;  %v5374_v54 = vld [vmem:[#allocation7 + $0x38c] ss:$16 sps:$4 sm:$0xff]   ;;  %v5369_v55 = vld [vmem:[#allocation7 + $0x380] ss:$16 sps:$4 sm:$0xff]  }
  0xa5   :  { %1542 = vmatpush1.bf16.msra.mxu0 %v5281_v56  ;;  %1706 = vmatpush1.bf16.msra.mxu1 %v5282_v57  ;;  %v5372_v56 = vld [vmem:[#allocation7 + $0x388] ss:$16 sps:$4 sm:$0xff]   ;;  %v5377_v57 = vld [vmem:[#allocation7 + $0x3a4] ss:$16 sps:$4 sm:$0xff]  }
  0xa6   :  { %1543 = vmatprep.subr.bf16.mxu0 %v5283_v58  ;;  %1707 = vmatprep.subr.bf16.mxu1 %v5285_v59  ;;  %v5380_v58 = vld [vmem:[#allocation7 + $0x3ac] ss:$16 sps:$4 sm:$0xff]   ;;  %v5375_v59 = vld [vmem:[#allocation7 + $0x3a0] ss:$16 sps:$4 sm:$0xff]  }
  0xa9   :  { %1544 = vmatpush1.bf16.msra.mxu0 %v5287_v60  ;;  %1708 = vmatpush1.bf16.msra.mxu1 %v5288_v61  ;;  %v5378_v60 = vld [vmem:[#allocation7 + $0x3a8] ss:$16 sps:$4 sm:$0xff]   ;;  %v5383_v61 = vld [vmem:[#allocation7 + $0x3c4] ss:$16 sps:$4 sm:$0xff]  }
  0xaa   :  { %1545 = vmatprep.subr.bf16.mxu0 %v5289_v62  ;;  %1709 = vmatprep.subr.bf16.mxu1 %v5291_v63  ;;  %v5386_v62 = vld [vmem:[#allocation7 + $0x3cc] ss:$16 sps:$4 sm:$0xff]   ;;  %v5381_v63 = vld [vmem:[#allocation7 + $0x3c0] ss:$16 sps:$4 sm:$0xff]  }
  0xad   :  { %1546 = vmatpush1.bf16.msra.mxu0 %v5293_v0  ;;  %1710 = vmatpush1.bf16.msra.mxu1 %v5294_v1  ;;  %v5384_v0 = vld [vmem:[#allocation7 + $0x3c8] ss:$16 sps:$4 sm:$0xff]   ;;  %v5389_v1 = vld [vmem:[#allocation7 + $0x3e4] ss:$16 sps:$4 sm:$0xff]  }
  0xae   :  { %1556 = vmatprep.subr.bf16.mxu0 %v5299_v2  ;;  %1720 = vmatprep.subr.bf16.mxu1 %v5302_v3  ;;  %v5392_v2 = vld [vmem:[#allocation7 + $0x3ec] ss:$16 sps:$4 sm:$0xff]   ;;  %v5387_v3 = vld [vmem:[#allocation7 + $0x3e0] ss:$16 sps:$4 sm:$0xff]  }
  0xb0   :  { %1548 = vmatmul.mubr.bf16.vlgmr.msra.gmra.mrb[0].mxu0 %v4521_v4  ;;  %1712 = vmatmul.mubr.bf16.vlgmr.msra.gmra.mrb[0].mxu1 %v4521_v4  ;;  %v5390_v4 = vld [vmem:[#allocation7 + $0x3e8] ss:$16 sps:$4 sm:$0xff]  }
  0xb1   :  { %1557 = vmatpush1.bf16.msra.mxu0 %v5297_v5  ;;  %1721 = vmatpush1.bf16.msra.mxu1 %v5300_v6  ;;  %v5397_v5 = vld [vmem:[#allocation7 + $0x404] ss:$16 sps:$4 sm:$0xff]   ;;  %v5400_v6 = vld [vmem:[#allocation7 + $0x40c] ss:$16 sps:$4 sm:$0xff]  }
  0xb2   :  { %1558 = vmatprep.subr.bf16.mxu0 %v5305_v7  ;;  %1722 = vmatprep.subr.bf16.mxu1 %v5308_v8  ;;  %v4523_v7 = vcombine.low %v6393_v29, %v6393_v29  ;;  %v5395_v8 = vld [vmem:[#allocation7 + $0x400] ss:$16 sps:$4 sm:$0xff]   ;;  %v5430_v29 = vld [vmem:[#allocation7 + $0x4ac] ss:$16 sps:$4 sm:$0xff]  }
  0xb3   :  { %1588 = vmatprep.mubr.bf16.mxu0 %v4524_v30  ;;  %1752 = vmatprep.mubr.bf16.mxu1 %v4524_v30  ;;  %v5425_v30 = vld [vmem:[#allocation7 + $0x4a0] ss:$16 sps:$4 sm:$0xff]  }
  0xb5   :  { %1559 = vmatpush1.bf16.msra.mxu0 %v5303_v9  ;;  %1723 = vmatpush1.bf16.msra.mxu1 %v5306_v10  ;;  %v5398_v9 = vld [vmem:[#allocation7 + $0x408] ss:$16 sps:$4 sm:$0xff]   ;;  %v5403_v10 = vld [vmem:[#allocation7 + $0x424] ss:$16 sps:$4 sm:$0xff]  }
  0xb6   :  { %1560 = vmatprep.subr.bf16.mxu0 %v5311_v11  ;;  %1724 = vmatprep.subr.bf16.mxu1 %v5314_v12  ;;  %v6399_v11 = vld [vmem:[#allocation2 + $0x10] sm:$0xff]  ;;  %v5406_v12 = vld [vmem:[#allocation7 + $0x42c] ss:$16 sps:$4 sm:$0xff]  }
  0xb9   :  { %1561 = vmatpush1.bf16.msra.mxu0 %v5309_v13  ;;  %1725 = vmatpush1.bf16.msra.mxu1 %v5312_v14  ;;  %v4526_v13 = vcombine.high %v6399_v11, %v6399_v11  ;;  %v5401_v14 = vld [vmem:[#allocation7 + $0x420] ss:$16 sps:$4 sm:$0xff]  }
  0xba   :  { %1562 = vmatprep.subr.bf16.mxu0 %v5317_v15  ;;  %1726 = vmatprep.subr.bf16.mxu1 %v5320_v16  ;;  %v5404_v15 = vld [vmem:[#allocation7 + $0x428] ss:$16 sps:$4 sm:$0xff]   ;;  %v5409_v16 = vld [vmem:[#allocation7 + $0x444] ss:$16 sps:$4 sm:$0xff]  }
  0xbd   :  { %1563 = vmatpush1.bf16.msra.mxu0 %v5315_v17  ;;  %1727 = vmatpush1.bf16.msra.mxu1 %v5318_v18  ;;  %v5412_v17 = vld [vmem:[#allocation7 + $0x44c] ss:$16 sps:$4 sm:$0xff]   ;;  %v5407_v18 = vld [vmem:[#allocation7 + $0x440] ss:$16 sps:$4 sm:$0xff]  }
  0xbe   :  { %1564 = vmatprep.subr.bf16.mxu0 %v5323_v19  ;;  %1728 = vmatprep.subr.bf16.mxu1 %v5326_v20  ;;  %v5410_v19 = vld [vmem:[#allocation7 + $0x448] ss:$16 sps:$4 sm:$0xff]   ;;  %v5415_v20 = vld [vmem:[#allocation7 + $0x464] ss:$16 sps:$4 sm:$0xff]  }
  0xc1   :  { %1565 = vmatpush1.bf16.msra.mxu0 %v5321_v21  ;;  %1729 = vmatpush1.bf16.msra.mxu1 %v5324_v22  ;;  %v5418_v21 = vld [vmem:[#allocation7 + $0x46c] ss:$16 sps:$4 sm:$0xff]   ;;  %v5413_v22 = vld [vmem:[#allocation7 + $0x460] ss:$16 sps:$4 sm:$0xff]  }
  0xc2   :  { %1566 = vmatprep.subr.bf16.mxu0 %v5329_v23  ;;  %1730 = vmatprep.subr.bf16.mxu1 %v5332_v24  ;;  %v5416_v23 = vld [vmem:[#allocation7 + $0x468] ss:$16 sps:$4 sm:$0xff]   ;;  %v5421_v24 = vld [vmem:[#allocation7 + $0x484] ss:$16 sps:$4 sm:$0xff]  }
  0xc5   :  { %1567 = vmatpush1.bf16.msra.mxu0 %v5327_v25  ;;  %1731 = vmatpush1.bf16.msra.mxu1 %v5330_v26  ;;  %v5424_v25 = vld [vmem:[#allocation7 + $0x48c] ss:$16 sps:$4 sm:$0xff]   ;;  %v5419_v26 = vld [vmem:[#allocation7 + $0x480] ss:$16 sps:$4 sm:$0xff]  }
  0xc6   :  { %1568 = vmatprep.subr.bf16.mxu0 %v5335_v27  ;;  %1732 = vmatprep.subr.bf16.mxu1 %v5338_v28  ;;  %v5422_v27 = vld [vmem:[#allocation7 + $0x488] ss:$16 sps:$4 sm:$0xff]   ;;  %v5427_v28 = vld [vmem:[#allocation7 + $0x4a4] ss:$16 sps:$4 sm:$0xff]  }
  0xc9   :  { %1569 = vmatpush1.bf16.msra.mxu0 %v5333_v31  ;;  %1733 = vmatpush1.bf16.msra.mxu1 %v5336_v32  ;;  %v5428_v31 = vld [vmem:[#allocation7 + $0x4a8] ss:$16 sps:$4 sm:$0xff]   ;;  %v5433_v32 = vld [vmem:[#allocation7 + $0x4c4] ss:$16 sps:$4 sm:$0xff]  }
  0xca   :  { %1570 = vmatprep.subr.bf16.mxu0 %v5341_v33  ;;  %1734 = vmatprep.subr.bf16.mxu1 %v5344_v34  ;;  %v5436_v33 = vld [vmem:[#allocation7 + $0x4cc] ss:$16 sps:$4 sm:$0xff]   ;;  %v5431_v34 = vld [vmem:[#allocation7 + $0x4c0] ss:$16 sps:$4 sm:$0xff]  }
  0xcd   :  { %1571 = vmatpush1.bf16.msra.mxu0 %v5339_v35  ;;  %1735 = vmatpush1.bf16.msra.mxu1 %v5342_v36  ;;  %v5434_v35 = vld [vmem:[#allocation7 + $0x4c8] ss:$16 sps:$4 sm:$0xff]   ;;  %v5439_v36 = vld [vmem:[#allocation7 + $0x4e4] ss:$16 sps:$4 sm:$0xff]  }
  0xce   :  { %1572 = vmatprep.subr.bf16.mxu0 %v5347_v37  ;;  %1736 = vmatprep.subr.bf16.mxu1 %v5350_v38  ;;  %v5442_v37 = vld [vmem:[#allocation7 + $0x4ec] ss:$16 sps:$4 sm:$0xff]   ;;  %v5437_v38 = vld [vmem:[#allocation7 + $0x4e0] ss:$16 sps:$4 sm:$0xff]  }
  0xd1   :  { %1573 = vmatpush1.bf16.msra.mxu0 %v5345_v39  ;;  %1737 = vmatpush1.bf16.msra.mxu1 %v5348_v40  ;;  %v5440_v39 = vld [vmem:[#allocation7 + $0x4e8] ss:$16 sps:$4 sm:$0xff]   ;;  %v5445_v40 = vld [vmem:[#allocation7 + $0x504] ss:$16 sps:$4 sm:$0xff]  }
  0xd2   :  { %1574 = vmatprep.subr.bf16.mxu0 %v5353_v41  ;;  %1738 = vmatprep.subr.bf16.mxu1 %v5356_v42  ;;  %v5448_v41 = vld [vmem:[#allocation7 + $0x50c] ss:$16 sps:$4 sm:$0xff]   ;;  %v5443_v42 = vld [vmem:[#allocation7 + $0x500] ss:$16 sps:$4 sm:$0xff]  }
  0xd5   :  { %1575 = vmatpush1.bf16.msra.mxu0 %v5351_v43  ;;  %1739 = vmatpush1.bf16.msra.mxu1 %v5354_v44  ;;  %v5446_v43 = vld [vmem:[#allocation7 + $0x508] ss:$16 sps:$4 sm:$0xff]   ;;  %v5451_v44 = vld [vmem:[#allocation7 + $0x524] ss:$16 sps:$4 sm:$0xff]  }
  0xd6   :  { %1576 = vmatprep.subr.bf16.mxu0 %v5359_v45  ;;  %1740 = vmatprep.subr.bf16.mxu1 %v5362_v46  ;;  %v5454_v45 = vld [vmem:[#allocation7 + $0x52c] ss:$16 sps:$4 sm:$0xff]   ;;  %v5449_v46 = vld [vmem:[#allocation7 + $0x520] ss:$16 sps:$4 sm:$0xff]  }
  0xd9   :  { %1577 = vmatpush1.bf16.msra.mxu0 %v5357_v47  ;;  %1741 = vmatpush1.bf16.msra.mxu1 %v5360_v48  ;;  %v5452_v47 = vld [vmem:[#allocation7 + $0x528] ss:$16 sps:$4 sm:$0xff]   ;;  %v5457_v48 = vld [vmem:[#allocation7 + $0x544] ss:$16 sps:$4 sm:$0xff]  }
  0xda   :  { %1578 = vmatprep.subr.bf16.mxu0 %v5365_v49  ;;  %1742 = vmatprep.subr.bf16.mxu1 %v5368_v50  ;;  %v5460_v49 = vld [vmem:[#allocation7 + $0x54c] ss:$16 sps:$4 sm:$0xff]   ;;  %v5455_v50 = vld [vmem:[#allocation7 + $0x540] ss:$16 sps:$4 sm:$0xff]  }
  0xdd   :  { %1579 = vmatpush1.bf16.msra.mxu0 %v5363_v51  ;;  %1743 = vmatpush1.bf16.msra.mxu1 %v5366_v52  ;;  %v5458_v51 = vld [vmem:[#allocation7 + $0x548] ss:$16 sps:$4 sm:$0xff]   ;;  %v5463_v52 = vld [vmem:[#allocation7 + $0x564] ss:$16 sps:$4 sm:$0xff]  }
  0xde   :  { %1580 = vmatprep.subr.bf16.mxu0 %v5371_v53  ;;  %1744 = vmatprep.subr.bf16.mxu1 %v5374_v54  ;;  %v5466_v53 = vld [vmem:[#allocation7 + $0x56c] ss:$16 sps:$4 sm:$0xff]   ;;  %v5461_v54 = vld [vmem:[#allocation7 + $0x560] ss:$16 sps:$4 sm:$0xff]  }
  0xe1   :  { %1581 = vmatpush1.bf16.msra.mxu0 %v5369_v55  ;;  %1745 = vmatpush1.bf16.msra.mxu1 %v5372_v56  ;;  %v5464_v55 = vld [vmem:[#allocation7 + $0x568] ss:$16 sps:$4 sm:$0xff]   ;;  %v5469_v56 = vld [vmem:[#allocation7 + $0x584] ss:$16 sps:$4 sm:$0xff]  }
  0xe2   :  { %1582 = vmatprep.subr.bf16.mxu0 %v5377_v57  ;;  %1746 = vmatprep.subr.bf16.mxu1 %v5380_v58  ;;  %v5472_v57 = vld [vmem:[#allocation7 + $0x58c] ss:$16 sps:$4 sm:$0xff]   ;;  %v5467_v58 = vld [vmem:[#allocation7 + $0x580] ss:$16 sps:$4 sm:$0xff]  }
  0xe5   :  { %1583 = vmatpush1.bf16.msra.mxu0 %v5375_v59  ;;  %1747 = vmatpush1.bf16.msra.mxu1 %v5378_v60  ;;  %v5470_v59 = vld [vmem:[#allocation7 + $0x588] ss:$16 sps:$4 sm:$0xff]   ;;  %v5475_v60 = vld [vmem:[#allocation7 + $0x5a4] ss:$16 sps:$4 sm:$0xff]  }
  0xe6   :  { %1584 = vmatprep.subr.bf16.mxu0 %v5383_v61  ;;  %1748 = vmatprep.subr.bf16.mxu1 %v5386_v62  ;;  %v5478_v61 = vld [vmem:[#allocation7 + $0x5ac] ss:$16 sps:$4 sm:$0xff]   ;;  %v5473_v62 = vld [vmem:[#allocation7 + $0x5a0] ss:$16 sps:$4 sm:$0xff]  }
  0xe9   :  { %1585 = vmatpush1.bf16.msra.mxu0 %v5381_v63  ;;  %1749 = vmatpush1.bf16.msra.mxu1 %v5384_v0  ;;  %v5476_v63 = vld [vmem:[#allocation7 + $0x5a8] ss:$16 sps:$4 sm:$0xff]   ;;  %v5481_v0 = vld [vmem:[#allocation7 + $0x5c4] ss:$16 sps:$4 sm:$0xff]  }
  0xea   :  { %1586 = vmatprep.subr.bf16.mxu0 %v5389_v1  ;;  %1750 = vmatprep.subr.bf16.mxu1 %v5392_v2  ;;  %v5484_v1 = vld [vmem:[#allocation7 + $0x5cc] ss:$16 sps:$4 sm:$0xff]   ;;  %v5479_v2 = vld [vmem:[#allocation7 + $0x5c0] ss:$16 sps:$4 sm:$0xff]  }
  0xed   :  { %1587 = vmatpush1.bf16.msra.mxu0 %v5387_v3  ;;  %1751 = vmatpush1.bf16.msra.mxu1 %v5390_v4  ;;  %v5482_v3 = vld [vmem:[#allocation7 + $0x5c8] ss:$16 sps:$4 sm:$0xff]   ;;  %v5487_v4 = vld [vmem:[#allocation7 + $0x5e4] ss:$16 sps:$4 sm:$0xff]  }
  0xee   :  { %1597 = vmatprep.subr.bf16.mxu0 %v5397_v5  ;;  %1761 = vmatprep.subr.bf16.mxu1 %v5400_v6  ;;  %v5490_v5 = vld [vmem:[#allocation7 + $0x5ec] ss:$16 sps:$4 sm:$0xff]   ;;  %v5485_v6 = vld [vmem:[#allocation7 + $0x5e0] ss:$16 sps:$4 sm:$0xff]  }
  0xf0   :  { %1589 = vmatmul.mubr.bf16.vlgmr.msra.gmra.mrb[0].mxu0 %v4523_v7  ;;  %1753 = vmatmul.mubr.bf16.vlgmr.msra.gmra.mrb[0].mxu1 %v4523_v7  ;;  %v5488_v7 = vld [vmem:[#allocation7 + $0x5e8] ss:$16 sps:$4 sm:$0xff]  }
  0xf1   :  { %1598 = vmatpush1.bf16.msra.mxu0 %v5395_v8  ;;  %1762 = vmatpush1.bf16.msra.mxu1 %v5398_v9  ;;  %v5495_v8 = vld [vmem:[#allocation7 + $0x604] ss:$16 sps:$4 sm:$0xff]   ;;  %v5498_v9 = vld [vmem:[#allocation7 + $0x60c] ss:$16 sps:$4 sm:$0xff]  }
  0xf2   :  { %1599 = vmatprep.subr.bf16.mxu0 %v5403_v10  ;;  %1763 = vmatprep.subr.bf16.mxu1 %v5406_v12  ;;  %v5493_v10 = vld [vmem:[#allocation7 + $0x600] ss:$16 sps:$4 sm:$0xff]   ;;  %v5496_v12 = vld [vmem:[#allocation7 + $0x608] ss:$16 sps:$4 sm:$0xff]  }
  0xf3   :  { %1629 = vmatprep.mubr.bf16.mxu0 %v4526_v13  ;;  %1793 = vmatprep.mubr.bf16.mxu1 %v4526_v13  ;;  %v4525_v13 = vcombine.low %v6399_v11, %v6399_v11  ;;  %v5513_v11 = vld [vmem:[#allocation7 + $0x664] ss:$16 sps:$4 sm:$0xff]  }
  0xf5   :  { %1600 = vmatpush1.bf16.msra.mxu0 %v5401_v14  ;;  %1764 = vmatpush1.bf16.msra.mxu1 %v5404_v15  ;;  %v5501_v14 = vld [vmem:[#allocation7 + $0x624] ss:$16 sps:$4 sm:$0xff]   ;;  %v5504_v15 = vld [vmem:[#allocation7 + $0x62c] ss:$16 sps:$4 sm:$0xff]  }
  0xf6   :  { %1601 = vmatprep.subr.bf16.mxu0 %v5409_v16  ;;  %1765 = vmatprep.subr.bf16.mxu1 %v5412_v17  ;;  %v5499_v16 = vld [vmem:[#allocation7 + $0x620] ss:$16 sps:$4 sm:$0xff]   ;;  %v5502_v17 = vld [vmem:[#allocation7 + $0x628] ss:$16 sps:$4 sm:$0xff]  }
  0xf9   :  { %1602 = vmatpush1.bf16.msra.mxu0 %v5407_v18  ;;  %1766 = vmatpush1.bf16.msra.mxu1 %v5410_v19  ;;  %v5507_v18 = vld [vmem:[#allocation7 + $0x644] ss:$16 sps:$4 sm:$0xff]   ;;  %v5510_v19 = vld [vmem:[#allocation7 + $0x64c] ss:$16 sps:$4 sm:$0xff]  }
  0xfa   :  { %1603 = vmatprep.subr.bf16.mxu0 %v5415_v20  ;;  %1767 = vmatprep.subr.bf16.mxu1 %v5418_v21  ;;  %v5505_v20 = vld [vmem:[#allocation7 + $0x640] ss:$16 sps:$4 sm:$0xff]   ;;  %v5508_v21 = vld [vmem:[#allocation7 + $0x648] ss:$16 sps:$4 sm:$0xff]  }
  0xfd   :  { %1604 = vmatpush1.bf16.msra.mxu0 %v5413_v22  ;;  %1768 = vmatpush1.bf16.msra.mxu1 %v5416_v23  ;;  %v6236_v22 = vmov 0   ;;  %v5516_v23 = vld [vmem:[#allocation7 + $0x66c] ss:$16 sps:$4 sm:$0xff]  }
  0xfe   :  { %1605 = vmatprep.subr.bf16.mxu0 %v5421_v24  ;;  %1769 = vmatprep.subr.bf16.mxu1 %v5424_v25  ;;  %v5511_v24 = vld [vmem:[#allocation7 + $0x660] ss:$16 sps:$4 sm:$0xff]   ;;  %v5514_v25 = vld [vmem:[#allocation7 + $0x668] ss:$16 sps:$4 sm:$0xff]  }
 0x101   :  { %1606 = vmatpush1.bf16.msra.mxu0 %v5419_v26  ;;  %1770 = vmatpush1.bf16.msra.mxu1 %v5422_v27  ;;  %v5519_v26 = vld [vmem:[#allocation7 + $0x684] ss:$16 sps:$4 sm:$0xff]   ;;  %v5522_v27 = vld [vmem:[#allocation7 + $0x68c] ss:$16 sps:$4 sm:$0xff]  }
 0x102   :  { %1607 = vmatprep.subr.bf16.mxu0 %v5427_v28  ;;  %1771 = vmatprep.subr.bf16.mxu1 %v5430_v29  ;;  %v5517_v28 = vld [vmem:[#allocation7 + $0x680] ss:$16 sps:$4 sm:$0xff]   ;;  %v5520_v29 = vld [vmem:[#allocation7 + $0x688] ss:$16 sps:$4 sm:$0xff]  }
 0x105   :  { %1608 = vmatpush1.bf16.msra.mxu0 %v5425_v30  ;;  %1772 = vmatpush1.bf16.msra.mxu1 %v5428_v31  ;;  %v5525_v30 = vld [vmem:[#allocation7 + $0x6a4] ss:$16 sps:$4 sm:$0xff]   ;;  %v5528_v31 = vld [vmem:[#allocation7 + $0x6ac] ss:$16 sps:$4 sm:$0xff]  }
 0x106   :  { %1609 = vmatprep.subr.bf16.mxu0 %v5433_v32  ;;  %1773 = vmatprep.subr.bf16.mxu1 %v5436_v33  ;;  %v5523_v32 = vld [vmem:[#allocation7 + $0x6a0] ss:$16 sps:$4 sm:$0xff]   ;;  %v5526_v33 = vld [vmem:[#allocation7 + $0x6a8] ss:$16 sps:$4 sm:$0xff]  }
 0x109   :  { %1610 = vmatpush1.bf16.msra.mxu0 %v5431_v34  ;;  %1774 = vmatpush1.bf16.msra.mxu1 %v5434_v35  ;;  %v5531_v34 = vld [vmem:[#allocation7 + $0x6c4] ss:$16 sps:$4 sm:$0xff]   ;;  %v5534_v35 = vld [vmem:[#allocation7 + $0x6cc] ss:$16 sps:$4 sm:$0xff]  }
 0x10a   :  { %1611 = vmatprep.subr.bf16.mxu0 %v5439_v36  ;;  %1775 = vmatprep.subr.bf16.mxu1 %v5442_v37  ;;  %v5529_v36 = vld [vmem:[#allocation7 + $0x6c0] ss:$16 sps:$4 sm:$0xff]   ;;  %v5532_v37 = vld [vmem:[#allocation7 + $0x6c8] ss:$16 sps:$4 sm:$0xff]  }
 0x10d   :  { %1612 = vmatpush1.bf16.msra.mxu0 %v5437_v38  ;;  %1776 = vmatpush1.bf16.msra.mxu1 %v5440_v39  ;;  %v5537_v38 = vld [vmem:[#allocation7 + $0x6e4] ss:$16 sps:$4 sm:$0xff]   ;;  %v5540_v39 = vld [vmem:[#allocation7 + $0x6ec] ss:$16 sps:$4 sm:$0xff]  }
 0x10e   :  { %1613 = vmatprep.subr.bf16.mxu0 %v5445_v40  ;;  %1777 = vmatprep.subr.bf16.mxu1 %v5448_v41  ;;  %v5535_v40 = vld [vmem:[#allocation7 + $0x6e0] ss:$16 sps:$4 sm:$0xff]   ;;  %v5538_v41 = vld [vmem:[#allocation7 + $0x6e8] ss:$16 sps:$4 sm:$0xff]  }
 0x111   :  { %1614 = vmatpush1.bf16.msra.mxu0 %v5443_v42  ;;  %1778 = vmatpush1.bf16.msra.mxu1 %v5446_v43  ;;  %v5544_v42 = vld [vmem:[#allocation8 + $0x4] ss:$8 sps:$4 sm:$0xff]   ;;  %v5541_v43 = vld [vmem:[#allocation2 + $0x18] ss:$0 sps:$4 sm:$0xff]  }
 0x112   :  { %1615 = vmatprep.subr.bf16.mxu0 %v5451_v44  ;;  %1779 = vmatprep.subr.bf16.mxu1 %v5454_v45  ;;  %v5542_v44 = vld [vmem:[#allocation8] ss:$8 sps:$4 sm:$0xff]   ;;  %v5547_v45 = vld [vmem:[#allocation8 + $0x14] ss:$8 sps:$4 sm:$0xff]  }
 0x115   :  { %1616 = vmatpush1.bf16.msra.mxu0 %v5449_v46  ;;  %1780 = vmatpush1.bf16.msra.mxu1 %v5452_v47  ;;  %v5545_v46 = vld [vmem:[#allocation8 + $0x10] ss:$8 sps:$4 sm:$0xff]   ;;  %v5550_v47 = vld [vmem:[#allocation8 + $0x24] ss:$8 sps:$4 sm:$0xff]  }
 0x116   :  { %1617 = vmatprep.subr.bf16.mxu0 %v5457_v48  ;;  %1781 = vmatprep.subr.bf16.mxu1 %v5460_v49  ;;  %v5548_v48 = vld [vmem:[#allocation8 + $0x20] ss:$8 sps:$4 sm:$0xff]   ;;  %v5553_v49 = vld [vmem:[#allocation8 + $0x34] ss:$8 sps:$4 sm:$0xff]  }
 0x119   :  { %1618 = vmatpush1.bf16.msra.mxu0 %v5455_v50  ;;  %1782 = vmatpush1.bf16.msra.mxu1 %v5458_v51  ;;  %v5551_v50 = vld [vmem:[#allocation8 + $0x30] ss:$8 sps:$4 sm:$0xff]   ;;  %v5556_v51 = vld [vmem:[#allocation8 + $0x44] ss:$8 sps:$4 sm:$0xff]  }
 0x11a   :  { %1619 = vmatprep.subr.bf16.mxu0 %v5463_v52  ;;  %1783 = vmatprep.subr.bf16.mxu1 %v5466_v53  ;;  %v5554_v52 = vld [vmem:[#allocation8 + $0x40] ss:$8 sps:$4 sm:$0xff]   ;;  %v5559_v53 = vld [vmem:[#allocation8 + $0x54] ss:$8 sps:$4 sm:$0xff]  }
 0x11d   :  { %1620 = vmatpush1.bf16.msra.mxu0 %v5461_v54  ;;  %1784 = vmatpush1.bf16.msra.mxu1 %v5464_v55  ;;  %v5557_v54 = vld [vmem:[#allocation8 + $0x50] ss:$8 sps:$4 sm:$0xff]   ;;  %v5562_v55 = vld [vmem:[#allocation8 + $0x64] ss:$8 sps:$4 sm:$0xff]  }
 0x11e   :  { %1621 = vmatprep.subr.bf16.mxu0 %v5469_v56  ;;  %1785 = vmatprep.subr.bf16.mxu1 %v5472_v57  ;;  %v5560_v56 = vld [vmem:[#allocation8 + $0x60] ss:$8 sps:$4 sm:$0xff]   ;;  %v5565_v57 = vld [vmem:[#allocation8 + $0x74] ss:$8 sps:$4 sm:$0xff]  }
 0x121   :  { %1622 = vmatpush1.bf16.msra.mxu0 %v5467_v58  ;;  %1786 = vmatpush1.bf16.msra.mxu1 %v5470_v59  ;;  %v5563_v58 = vld [vmem:[#allocation8 + $0x70] ss:$8 sps:$4 sm:$0xff]   ;;  %v5568_v59 = vld [vmem:[#allocation8 + $0x84] ss:$8 sps:$4 sm:$0xff]  }
 0x122   :  { %1623 = vmatprep.subr.bf16.mxu0 %v5475_v60  ;;  %1787 = vmatprep.subr.bf16.mxu1 %v5478_v61  ;;  %v5566_v60 = vld [vmem:[#allocation8 + $0x80] ss:$8 sps:$4 sm:$0xff]   ;;  %v5571_v61 = vld [vmem:[#allocation8 + $0x94] ss:$8 sps:$4 sm:$0xff]  }
 0x125   :  { %1624 = vmatpush1.bf16.msra.mxu0 %v5473_v62  ;;  %1788 = vmatpush1.bf16.msra.mxu1 %v5476_v63  ;;  %v5569_v62 = vld [vmem:[#allocation8 + $0x90] ss:$8 sps:$4 sm:$0xff]   ;;  %v5574_v63 = vld [vmem:[#allocation8 + $0xa4] ss:$8 sps:$4 sm:$0xff]  }
 0x126   :  { %1625 = vmatprep.subr.bf16.mxu0 %v5481_v0  ;;  %1789 = vmatprep.subr.bf16.mxu1 %v5484_v1  ;;  %v5572_v0 = vld [vmem:[#allocation8 + $0xa0] ss:$8 sps:$4 sm:$0xff]   ;;  %v5577_v1 = vld [vmem:[#allocation8 + $0xb4] ss:$8 sps:$4 sm:$0xff]  }
 0x129   :  { %1626 = vmatpush1.bf16.msra.mxu0 %v5479_v2  ;;  %1790 = vmatpush1.bf16.msra.mxu1 %v5482_v3  ;;  %v5575_v2 = vld [vmem:[#allocation8 + $0xb0] ss:$8 sps:$4 sm:$0xff]   ;;  %v5580_v3 = vld [vmem:[#allocation8 + $0xc4] ss:$8 sps:$4 sm:$0xff]  }
 0x12a   :  { %1627 = vmatprep.subr.bf16.mxu0 %v5487_v4  ;;  %1791 = vmatprep.subr.bf16.mxu1 %v5490_v5  ;;  %v5578_v4 = vld [vmem:[#allocation8 + $0xc0] ss:$8 sps:$4 sm:$0xff]   ;;  %v5583_v5 = vld [vmem:[#allocation8 + $0xd4] ss:$8 sps:$4 sm:$0xff]  }
 0x12d   :  { %1628 = vmatpush1.bf16.msra.mxu0 %v5485_v6  ;;  %1792 = vmatpush1.bf16.msra.mxu1 %v5488_v7  ;;  %v5581_v6 = vld [vmem:[#allocation8 + $0xd0] ss:$8 sps:$4 sm:$0xff]   ;;  %v5586_v7 = vld [vmem:[#allocation8 + $0xe4] ss:$8 sps:$4 sm:$0xff]  }
 0x12e   :  { %1638 = vmatprep.subr.bf16.mxu0 %v5495_v8  ;;  %1802 = vmatprep.subr.bf16.mxu1 %v5498_v9  ;;  %v5584_v8 = vld [vmem:[#allocation8 + $0xe0] ss:$8 sps:$4 sm:$0xff]   ;;  %v5589_v9 = vld [vmem:[#allocation8 + $0xf4] ss:$8 sps:$4 sm:$0xff]  }
 0x130   :  { %1630 = vmatmul.mubr.bf16.vlgmr.msra.gmra.mrb[0].mxu0 %v4525_v13  ;;  %1794 = vmatmul.mubr.bf16.vlgmr.msra.gmra.mrb[0].mxu1 %v4525_v13  ;;  %v5638_v13 = vld [vmem:[#allocation10] ss:$16 sps:$4 sm:$0xff]  }
 0x131   :  { %1639 = vmatpush1.bf16.msra.mxu0 %v5493_v10  ;;  %1803 = vmatpush1.bf16.msra.mxu1 %v5496_v12  ;;  %v5587_v10 = vld [vmem:[#allocation8 + $0xf0] ss:$8 sps:$4 sm:$0xff]   ;;  %v5592_v12 = vld [vmem:[#allocation8 + $0x104] ss:$8 sps:$4 sm:$0xff]  }
 0x132   :  { %1640 = vmatprep.subr.bf16.mxu0 %v5501_v14  ;;  %1804 = vmatprep.subr.bf16.mxu1 %v5504_v15  ;;  %v5640_v14 = vld [vmem:[#allocation10 + $0x4] ss:$16 sps:$4 sm:$0xff]  }
 0x133   :  { %1670 = vmatprep.mubr.bf16.mxu0 %v6236_v22  ;;  %1834 = vmatprep.mubr.bf16.mxu1 %v6236_v22  ;;  %v5643_v15 = vld [vmem:[#allocation10 + $0x24] ss:$16 sps:$4 sm:$0xff]  }
 0x135   :  { %1641 = vmatpush1.bf16.msra.mxu0 %v5499_v16  ;;  %1805 = vmatpush1.bf16.msra.mxu1 %v5502_v17  ;;  %v5641_v16 = vld [vmem:[#allocation10 + $0x20] ss:$16 sps:$4 sm:$0xff]   ;;  %v350_v17 = vlaneseq }
 0x136   :  { %1642 = vmatprep.subr.bf16.mxu0 %v5507_v18  ;;  %1806 = vmatprep.subr.bf16.mxu1 %v5510_v19 }
 0x137   :  { %v6408_v18 = vshrl.u32 %v350_v17, 7  ;;  %v5644_v17 = vld [vmem:[#allocation10 + $0x40] ss:$16 sps:$4 sm:$0xff]  }
 0x139   :  { %1643 = vmatpush1.bf16.msra.mxu0 %v5505_v20  ;;  %1807 = vmatpush1.bf16.msra.mxu1 %v5508_v21  ;;  %v6411_v19 = vsub.s32 0, %v6408_v18  ;;  %v6416_v20 = vld [vmem:[%s6534_s3] sm:$0xf]  ;;  %v6419_v21 = vsub.s32 1, %v6408_v18 }
 0x13a   :  { %1644 = vmatprep.subr.bf16.mxu0 %v5513_v11  ;;  %1808 = vmatprep.subr.bf16.mxu1 %v5516_v23  ;;  %v6422_v11 = vsub.s32 3, %v6408_v18 }
 0x13b   :  { %v353_v23 = vrot.slane %v6416_v20, %v6411_v19 }
 0x13d   :  { %1645 = vmatpush1.bf16.msra.mxu0 %v5511_v24  ;;  %1809 = vmatpush1.bf16.msra.mxu1 %v5514_v25  ;;  %v357_v24 = vrot.slane %v6416_v20, %v6419_v21  ;;  %v365_v25 = vrot.slane %v6416_v20, %v6422_v11 }
 0x13e   :  { %1646 = vmatprep.subr.bf16.mxu0 %v5519_v26  ;;  %1810 = vmatprep.subr.bf16.mxu1 %v5522_v27 }
 0x141   :  { %1647 = vmatpush1.bf16.msra.mxu0 %v5517_v28  ;;  %1811 = vmatpush1.bf16.msra.mxu1 %v5520_v29 }
 0x142   :  { %1648 = vmatprep.subr.bf16.mxu0 %v5525_v30  ;;  %1812 = vmatprep.subr.bf16.mxu1 %v5528_v31 }
 0x145   :  { %1649 = vmatpush1.bf16.msra.mxu0 %v5523_v32  ;;  %1813 = vmatpush1.bf16.msra.mxu1 %v5526_v33 }
 0x146   :  { %1650 = vmatprep.subr.bf16.mxu0 %v5531_v34  ;;  %1814 = vmatprep.subr.bf16.mxu1 %v5534_v35 }
 0x149   :  { %1651 = vmatpush1.bf16.msra.mxu0 %v5529_v36  ;;  %1815 = vmatpush1.bf16.msra.mxu1 %v5532_v37 }
 0x14a   :  { %1652 = vmatprep.subr.bf16.mxu0 %v5537_v38  ;;  %1816 = vmatprep.subr.bf16.mxu1 %v5540_v39 }
 0x14d   :  { %1653 = vmatpush1.bf16.msra.mxu0 %v5535_v40  ;;  %1817 = vmatpush1.bf16.msra.mxu1 %v5538_v41  ;;  %v5590_v41 = vld [vmem:[#allocation8 + $0x100] ss:$8 sps:$4 sm:$0xff]  }
 0x14e   :  { %2247 = vmatprep.subr.bf16.mxu0 %v5544_v42  ;;  %2549 = vmatprep.subr.bf16.mxu1 %v5640_v14 }
 0x150   :  { %1671 = vmatmul.mubr.bf16.vlgmr.msra.gmra.mrb[0].mxu0 %v5541_v43  ;;  %1835 = vmatmul.mubr.bf16.vlgmr.msra.gmra.mrb[0].mxu1 %v5541_v43  ;;  %v5595_v43 = vld [vmem:[#allocation8 + $0x114] ss:$8 sps:$4 sm:$0xff]  }
 0x151   :  { %2248 = vmatpush1.bf16.msra.mxu0 %v5542_v44  ;;  %2581 = vmatprep.mubr.bf16.mxu1 %v6236_v22 }
 0x152   :  { %2249 = vmatprep.subr.bf16.mxu0 %v5547_v45  ;;  %2550 = vmatpush1.bf16.msra.mxu1 %v5638_v13  ;;  %v5593_v45 = vld [vmem:[#allocation8 + $0x110] ss:$8 sps:$4 sm:$0xff]  }
 0x153   :  { %2551 = vmatprep.subr.bf16.mxu1 %v5643_v15  ;;  %v5635_v13 = vld [vmem:[#allocation8 + $0x1f0] ss:$8 sps:$4 sm:$0xff]  }
 0x155   :  { %2250 = vmatpush1.bf16.msra.mxu0 %v5545_v46  ;;  %v5598_v46 = vld [vmem:[#allocation8 + $0x124] ss:$8 sps:$4 sm:$0xff]  }
 0x156   :  { %2251 = vmatprep.subr.bf16.mxu0 %v5550_v47  ;;  %2552 = vmatpush1.bf16.msra.mxu1 %v5641_v16  ;;  %v5596_v47 = vld [vmem:[#allocation8 + $0x120] ss:$8 sps:$4 sm:$0xff]   ;;  %v5646_v16 = vld [vmem:[#allocation10 + $0x44] ss:$16 sps:$4 sm:$0xff]  }
 0x157   :  { %2553 = vmatprep.subr.bf16.mxu1 %v5646_v16  ;;  %v5671_v16 = vld [vmem:[#allocation10 + $0x68] ss:$16 sps:$4 sm:$0xff]  }
 0x159   :  { %2252 = vmatpush1.bf16.msra.mxu0 %v5548_v48  ;;  %v5601_v48 = vld [vmem:[#allocation8 + $0x134] ss:$8 sps:$4 sm:$0xff]  }
 0x15a   :  { %2253 = vmatprep.subr.bf16.mxu0 %v5553_v49  ;;  %v5599_v49 = vld [vmem:[#allocation8 + $0x130] ss:$8 sps:$4 sm:$0xff]   ;;  %2554 = vmatpush1.bf16.msra.mxu1 %v5644_v17 }
 0x15b   :  { %v5757_v17 = vld [vmem:[#allocation11 + $0x274] ss:$28 sps:$4 sm:$0xff]  }
 0x15d   :  { %2254 = vmatpush1.bf16.msra.mxu0 %v5551_v50  ;;  %v5604_v50 = vld [vmem:[#allocation8 + $0x144] ss:$8 sps:$4 sm:$0xff]  }
 0x15e   :  { %2255 = vmatprep.subr.bf16.mxu0 %v5556_v51  ;;  %v5602_v51 = vld [vmem:[#allocation8 + $0x140] ss:$8 sps:$4 sm:$0xff]  }
 0x161   :  { %2256 = vmatpush1.bf16.msra.mxu0 %v5554_v52  ;;  %v5607_v52 = vld [vmem:[#allocation8 + $0x154] ss:$8 sps:$4 sm:$0xff]  }
 0x162   :  { %2257 = vmatprep.subr.bf16.mxu0 %v5559_v53  ;;  %v5605_v53 = vld [vmem:[#allocation8 + $0x150] ss:$8 sps:$4 sm:$0xff]  }
 0x165   :  { %2258 = vmatpush1.bf16.msra.mxu0 %v5557_v54  ;;  %v5610_v54 = vld [vmem:[#allocation8 + $0x164] ss:$8 sps:$4 sm:$0xff]  }
 0x166   :  { %2259 = vmatprep.subr.bf16.mxu0 %v5562_v55  ;;  %v5608_v55 = vld [vmem:[#allocation8 + $0x160] ss:$8 sps:$4 sm:$0xff]  }
 0x169   :  { %2260 = vmatpush1.bf16.msra.mxu0 %v5560_v56  ;;  %v5613_v56 = vld [vmem:[#allocation8 + $0x174] ss:$8 sps:$4 sm:$0xff]  }
 0x16a   :  { %2261 = vmatprep.subr.bf16.mxu0 %v5565_v57  ;;  %v5611_v57 = vld [vmem:[#allocation8 + $0x170] ss:$8 sps:$4 sm:$0xff]  }
 0x16d   :  { %2262 = vmatpush1.bf16.msra.mxu0 %v5563_v58  ;;  %v5616_v58 = vld [vmem:[#allocation8 + $0x184] ss:$8 sps:$4 sm:$0xff]  }
 0x16e   :  { %2263 = vmatprep.subr.bf16.mxu0 %v5568_v59  ;;  %v5614_v59 = vld [vmem:[#allocation8 + $0x180] ss:$8 sps:$4 sm:$0xff]  }
 0x171   :  { %2264 = vmatpush1.bf16.msra.mxu0 %v5566_v60  ;;  %v5619_v60 = vld [vmem:[#allocation8 + $0x194] ss:$8 sps:$4 sm:$0xff]  }
 0x172   :  { %2265 = vmatprep.subr.bf16.mxu0 %v5571_v61  ;;  %v5617_v61 = vld [vmem:[#allocation8 + $0x190] ss:$8 sps:$4 sm:$0xff]  }
 0x175   :  { %2266 = vmatpush1.bf16.msra.mxu0 %v5569_v62  ;;  %v5622_v62 = vld [vmem:[#allocation8 + $0x1a4] ss:$8 sps:$4 sm:$0xff]  }
 0x176   :  { %2267 = vmatprep.subr.bf16.mxu0 %v5574_v63  ;;  %v5620_v63 = vld [vmem:[#allocation8 + $0x1a0] ss:$8 sps:$4 sm:$0xff]  }
 0x179   :  { %2268 = vmatpush1.bf16.msra.mxu0 %v5572_v0  ;;  %v5625_v0 = vld [vmem:[#allocation8 + $0x1b4] ss:$8 sps:$4 sm:$0xff]  }
 0x17a   :  { %2269 = vmatprep.subr.bf16.mxu0 %v5577_v1  ;;  %v5623_v1 = vld [vmem:[#allocation8 + $0x1b0] ss:$8 sps:$4 sm:$0xff]  }
 0x17d   :  { %2270 = vmatpush1.bf16.msra.mxu0 %v5575_v2  ;;  %v5628_v2 = vld [vmem:[#allocation8 + $0x1c4] ss:$8 sps:$4 sm:$0xff]  }
 0x17e   :  { %2271 = vmatprep.subr.bf16.mxu0 %v5580_v3  ;;  %v5626_v3 = vld [vmem:[#allocation8 + $0x1c0] ss:$8 sps:$4 sm:$0xff]  }
 0x181   :  { %2272 = vmatpush1.bf16.msra.mxu0 %v5578_v4  ;;  %v6433_v4 = vsub.s32 2, %v6408_v18 }
 0x182   :  { %2273 = vmatprep.subr.bf16.mxu0 %v5583_v5  ;;  %v5631_v5 = vld [vmem:[#allocation8 + $0x1d4] ss:$8 sps:$4 sm:$0xff]  }
 0x185   :  { %2274 = vmatpush1.bf16.msra.mxu0 %v5581_v6  ;;  %v5629_v6 = vld [vmem:[#allocation8 + $0x1d0] ss:$8 sps:$4 sm:$0xff]  }
 0x186   :  { %2275 = vmatprep.subr.bf16.mxu0 %v5586_v7  ;;  %v361_v7 = vrot.slane %v6416_v20, %v6433_v4  ;;  %v5649_v20 = vld [vmem:[#allocation10 + $0x64] ss:$16 sps:$4 sm:$0xff]  }
 0x187   :  { %2555 = vmatprep.subr.bf16.mxu1 %v5649_v20  ;;  %v5755_v20 = vld [vmem:[#allocation11 + $0x270] ss:$28 sps:$4 sm:$0xff]  }
 0x189   :  { %2276 = vmatpush1.bf16.msra.mxu0 %v5584_v8  ;;  %v5634_v8 = vld [vmem:[#allocation8 + $0x1e4] ss:$8 sps:$4 sm:$0xff]  }
 0x18a   :  { %2277 = vmatprep.subr.bf16.mxu0 %v5589_v9  ;;  %v5632_v9 = vld [vmem:[#allocation8 + $0x1e0] ss:$8 sps:$4 sm:$0xff]  }
 0x18d   :  { %2278 = vmatpush1.bf16.msra.mxu0 %v5587_v10 }
 0x18e   :  { %2288 = vmatprep.subr.bf16.mxu0 %v5592_v12  ;;  %v5637_v12 = vld [vmem:[#allocation8 + $0x1f4] ss:$8 sps:$4 sm:$0xff]  }
 0x223   :  { %v1672_v26 = vpop.f32.mrb[0].mxu0  ;;  %v6430_v27 = vpop.f32.mrb[0].mxu1 }
 0x224   :  { %v5131_v28 = vadd.f32 %v1672_v26, %v353_v23  ;;  %v1674_v29 = vpop.f32.mrb[1].mxu0  ;;  %v1838_v30 = vpop.f32.mrb[1].mxu1  ;;  %v5133_v10 = vadd.f32 %v6430_v27, %v361_v7  ;;  %v5647_v23 = vld [vmem:[#allocation10 + $0x60] ss:$16 sps:$4 sm:$0xff]   ;;  %v5655_v26 = vld [vmem:[#allocation10 + $0xa4] ss:$16 sps:$4 sm:$0xff]  }
 0x225   :  { %v5132_v31 = vadd.f32 %v1674_v29, %v357_v24  ;;  %v5134_v32 = vadd.f32 %v1838_v30, %v365_v25  ;;  %v1676_v33 = vpop.f32.mrb[2].mxu0  ;;  %v1840_v34 = vpop.f32.mrb[2].mxu1  ;;  %2556 = vmatpush1.bf16.msra.mxu1 %v5647_v23  ;;  %v5652_v24 = vld [vmem:[#allocation10 + $0x84] ss:$16 sps:$4 sm:$0xff]   ;;  %v5650_v25 = vld [vmem:[#allocation10 + $0x80] ss:$16 sps:$4 sm:$0xff]  }
 0x226   :  { %v1843_v35 = vmax.f32 %v5131_v28, 0.0  ;;  %v1677_v36 = vpop.f32.mrb[3].mxu0  ;;  %v1841_v37 = vpop.f32.mrb[3].mxu1  ;;  %v1845_v14 = vmax.f32 %v5133_v10, 0.0  ;;  %2557 = vmatprep.subr.bf16.mxu1 %v5652_v24  ;;  %v5653_v27 = vld [vmem:[#allocation10 + $0xa0] ss:$16 sps:$4 sm:$0xff]  }
 0x227   :  { %v1844_v38 = vmax.f32 %v5132_v31, 0.0  ;;  %v1846_v39 = vmax.f32 %v5134_v32, 0.0  ;;  %v5658_v28 = vld [vmem:[#allocation10 + $0xc4] ss:$16 sps:$4 sm:$0xff]   ;;  %v5656_v29 = vld [vmem:[#allocation10 + $0xc0] ss:$16 sps:$4 sm:$0xff]  }
 0x228   :  { %v1847_v42 = vpack.c.bf16 %v1843_v35, %v1843_v35  ;;  %v1849_v15 = vpack.c.bf16 %v1845_v14, %v1845_v14  ;;  %v5661_v30 = vld [vmem:[#allocation10 + $0xe4] ss:$16 sps:$4 sm:$0xff]   ;;  %v5659_v31 = vld [vmem:[#allocation10 + $0xe0] ss:$16 sps:$4 sm:$0xff]   ;;  %v5664_v32 = vld [vmem:[#allocation10 + $0xc] ss:$16 sps:$4 sm:$0xff]  }
 0x229   :  { %v1848_v40 = vpack.c.bf16 %v1844_v38, %v1844_v38  ;;  %v1850_v44 = vpack.c.bf16 %v1846_v39, %v1846_v39  ;;  %2558 = vmatpush1.bf16.msra.mxu1 %v5650_v25  ;;  %v5689_v33 = vld [vmem:[#allocation11 + $0x8] ss:$28 sps:$4 sm:$0xff]   ;;  %v1915_v35 = vld [vmem:[%s6536_s5] sm:$0x3]  ;;  %v5703_v39 = vld [vmem:[#allocation11 + $0x7c] ss:$28 sps:$4 sm:$0xff]  }
 0x22a   :  { %2559 = vmatprep.subr.bf16.mxu1 %v5655_v26  ;;  %v5691_v34 = vld [vmem:[#allocation11 + $0xc] ss:$28 sps:$4 sm:$0xff]   ;;  %v5697_v36 = vld [vmem:[#allocation11 + $0x44] ss:$28 sps:$4 sm:$0xff]   ;;  %v1924_v38 = vrot.slane %v1915_v35, %v6419_v21 }
 0x22b   :  { %2279 = vmatprep.mubr.bf16.mxu0 %v1848_v40  ;;  %v5695_v37 = vld [vmem:[#allocation11 + $0x40] ss:$28 sps:$4 sm:$0xff]   ;;  %v5665_v7 = vld [vmem:[#allocation10 + $0x28] ss:$16 sps:$4 sm:$0xff]  }
 0x22c   :  { %2280 = vmatmul.mubr.bf16.vlgmr.msra.gmra.mrb[4].mxu0 %v1847_v42  ;;  %v5701_v42 = vld [vmem:[#allocation11 + $0x78] ss:$28 sps:$4 sm:$0xff]   ;;  %v5743_v10 = vld [vmem:[#allocation11 + $0x200] ss:$28 sps:$4 sm:$0xff]   ;;  %v5763_v24 = vld [vmem:[#allocation11 + $0x2ac] ss:$28 sps:$4 sm:$0xff]  }
 0x22d   :  { %2289 = vmatpush1.bf16.msra.mxu0 %v5590_v41  ;;  %2320 = vmatprep.mubr.bf16.mxu0 %v1850_v44  ;;  %v5673_v14 = vld [vmem:[#allocation10 + $0x6c] ss:$16 sps:$4 sm:$0xff]   ;;  %v5674_v23 = vld [vmem:[#allocation10 + $0x88] ss:$16 sps:$4 sm:$0xff]  }
 0x22e   :  { %2290 = vmatprep.subr.bf16.mxu0 %v5595_v43  ;;  %2560 = vmatpush1.bf16.msra.mxu1 %v5653_v27  ;;  %v5679_v25 = vld [vmem:[#allocation10 + $0xac] ss:$16 sps:$4 sm:$0xff]   ;;  %v5761_v26 = vld [vmem:[#allocation11 + $0x2a8] ss:$28 sps:$4 sm:$0xff]  }
 0x22f   :  { %2561 = vmatprep.subr.bf16.mxu1 %v5658_v28  ;;  %v5677_v27 = vld [vmem:[#allocation10 + $0xa8] ss:$16 sps:$4 sm:$0xff]   ;;  %v5769_v28 = vld [vmem:[#allocation11 + $0x2e4] ss:$28 sps:$4 sm:$0xff]  }
 0x231   :  { %2291 = vmatpush1.bf16.msra.mxu0 %v5593_v45  ;;  %v5709_v45 = vld [vmem:[#allocation11 + $0xb4] ss:$28 sps:$4 sm:$0xff]  }
 0x232   :  { %2292 = vmatprep.subr.bf16.mxu0 %v5598_v46  ;;  %2562 = vmatpush1.bf16.msra.mxu1 %v5656_v29  ;;  %v5682_v29 = vld [vmem:[#allocation10 + $0xcc] ss:$16 sps:$4 sm:$0xff]  }
 0x233   :  { %2563 = vmatprep.subr.bf16.mxu1 %v5661_v30  ;;  %v5767_v30 = vld [vmem:[#allocation11 + $0x2e0] ss:$28 sps:$4 sm:$0xff]  }
 0x235   :  { %2293 = vmatpush1.bf16.msra.mxu0 %v5596_v47 }
 0x236   :  { %2294 = vmatprep.subr.bf16.mxu0 %v5601_v48  ;;  %2564 = vmatpush1.bf16.msra.mxu1 %v5659_v31  ;;  %v5707_v48 = vld [vmem:[#allocation11 + $0xb0] ss:$28 sps:$4 sm:$0xff]   ;;  %v5680_v31 = vld [vmem:[#allocation10 + $0xc8] ss:$16 sps:$4 sm:$0xff]  }
 0x237   :  { %2590 = vmatprep.subr.bf16.mxu1 %v5664_v32  ;;  %v5685_v32 = vld [vmem:[#allocation10 + $0xec] ss:$16 sps:$4 sm:$0xff]  }
 0x239   :  { %2295 = vmatpush1.bf16.msra.mxu0 %v5599_v49 }
 0x23a   :  { %2296 = vmatprep.subr.bf16.mxu0 %v5604_v50  ;;  %v5715_v50 = vld [vmem:[#allocation11 + $0xec] ss:$28 sps:$4 sm:$0xff]  }
 0x23d   :  { %2297 = vmatpush1.bf16.msra.mxu0 %v5602_v51  ;;  %v5713_v51 = vld [vmem:[#allocation11 + $0xe8] ss:$28 sps:$4 sm:$0xff]  }
 0x23e   :  { %2298 = vmatprep.subr.bf16.mxu0 %v5607_v52  ;;  %v5721_v52 = vld [vmem:[#allocation11 + $0x124] ss:$28 sps:$4 sm:$0xff]  }
 0x241   :  { %2299 = vmatpush1.bf16.msra.mxu0 %v5605_v53  ;;  %v122_v53 = vld [vmem:[#allocation5] sm:$0xf] }
 0x242   :  { %2300 = vmatprep.subr.bf16.mxu0 %v5610_v54  ;;  %v5719_v54 = vld [vmem:[#allocation11 + $0x120] ss:$28 sps:$4 sm:$0xff]  }
 0x245   :  { %2301 = vmatpush1.bf16.msra.mxu0 %v5608_v55  ;;  %v5727_v55 = vld [vmem:[#allocation11 + $0x15c] ss:$28 sps:$4 sm:$0xff]  }
 0x246   :  { %2302 = vmatprep.subr.bf16.mxu0 %v5613_v56  ;;  %v1920_v56 = vrot.slane %v1915_v35, %v6411_v19  ;;  %v5686_v35 = vld [vmem:[#allocation11] ss:$28 sps:$4 sm:$0xff]  }
 0x249   :  { %2303 = vmatpush1.bf16.msra.mxu0 %v5611_v57  ;;  %v123_v57 = vunpack.c.l.bf16 %v122_v53  ;;  %v5740_v53 = vld [vmem:[#allocation11 + $0x1f8] ss:$28 sps:$4 sm:$0xff]  }
 0x24a   :  { %2304 = vmatprep.subr.bf16.mxu0 %v5616_v58  ;;  %v5725_v58 = vld [vmem:[#allocation11 + $0x158] ss:$28 sps:$4 sm:$0xff]  }
 0x24d   :  { %2305 = vmatpush1.bf16.msra.mxu0 %v5614_v59 }
 0x24e   :  { %2306 = vmatprep.subr.bf16.mxu0 %v5619_v60  ;;  %v5733_v60 = vld [vmem:[#allocation11 + $0x194] ss:$28 sps:$4 sm:$0xff]  }
 0x251   :  { %2307 = vmatpush1.bf16.msra.mxu0 %v5617_v61 }
 0x252   :  { %2308 = vmatprep.subr.bf16.mxu0 %v5622_v62 }
 0x255   :  { %2309 = vmatpush1.bf16.msra.mxu0 %v5620_v63 }
 0x256   :  { %2310 = vmatprep.subr.bf16.mxu0 %v5625_v0  ;;  %v5731_v0 = vld [vmem:[#allocation11 + $0x190] ss:$28 sps:$4 sm:$0xff]  }
 0x259   :  { %2311 = vmatpush1.bf16.msra.mxu0 %v5623_v1  ;;  %v5662_v1 = vld [vmem:[#allocation10 + $0x8] ss:$16 sps:$4 sm:$0xff]  }
 0x25a   :  { %2312 = vmatprep.subr.bf16.mxu0 %v5628_v2 }
 0x25d   :  { %2313 = vmatpush1.bf16.msra.mxu0 %v5626_v3  ;;  %v5667_v3 = vld [vmem:[#allocation10 + $0x2c] ss:$16 sps:$4 sm:$0xff]  }
 0x25e   :  { %2314 = vmatprep.subr.bf16.mxu0 %v5631_v5  ;;  %v5739_v5 = vld [vmem:[#allocation11 + $0x1cc] ss:$28 sps:$4 sm:$0xff]  }
 0x261   :  { %2315 = vmatpush1.bf16.msra.mxu0 %v5629_v6  ;;  %v5737_v6 = vld [vmem:[#allocation11 + $0x1c8] ss:$28 sps:$4 sm:$0xff]  }
 0x262   :  { %2316 = vmatprep.subr.bf16.mxu0 %v5634_v8  ;;  %v5745_v8 = vld [vmem:[#allocation11 + $0x204] ss:$28 sps:$4 sm:$0xff]  }
 0x265   :  { %2317 = vmatpush1.bf16.msra.mxu0 %v5632_v9  ;;  %v5670_v9 = vld [vmem:[#allocation10 + $0x4c] ss:$16 sps:$4 sm:$0xff]  }
 0x266   :  { %2318 = vmatprep.subr.bf16.mxu0 %v5637_v12  ;;  %v5668_v12 = vld [vmem:[#allocation10 + $0x48] ss:$16 sps:$4 sm:$0xff]  }
 0x269   :  { %2319 = vmatpush1.bf16.msra.mxu0 %v5635_v13  ;;  %v5751_v13 = vld [vmem:[#allocation11 + $0x23c] ss:$28 sps:$4 sm:$0xff]  }
 0x26a   :  { %4166 = vmatprep.subr.bf16.mxu0 %v5691_v34  ;;  %v5688_v34 = vld [vmem:[#allocation11 + $0x4] ss:$28 sps:$4 sm:$0xff]  }
 0x26c   :  { %2321 = vmatmul.mubr.bf16.vlgmr.msra.gmra.mrb[4].mxu0 %v1849_v15  ;;  %v5749_v15 = vld [vmem:[#allocation11 + $0x238] ss:$28 sps:$4 sm:$0xff]  }
 0x26d   :  { %4167 = vmatpush1.bf16.msra.mxu0 %v5689_v33  ;;  %v5683_v33 = vld [vmem:[#allocation10 + $0xe8] ss:$16 sps:$4 sm:$0xff]  }
 0x26e   :  { %4168 = vmatprep.subr.bf16.mxu0 %v5697_v36  ;;  %v5694_v36 = vld [vmem:[#allocation11 + $0x3c] ss:$28 sps:$4 sm:$0xff]  }
 0x271   :  { %4169 = vmatpush1.bf16.msra.mxu0 %v5695_v37  ;;  %v5692_v37 = vld [vmem:[#allocation11 + $0x38] ss:$28 sps:$4 sm:$0xff]  }
 0x272   :  { %4170 = vmatprep.subr.bf16.mxu0 %v5703_v39  ;;  %v5698_v39 = vld [vmem:[#allocation11 + $0x70] ss:$28 sps:$4 sm:$0xff]  }
 0x275   :  { %4171 = vmatpush1.bf16.msra.mxu0 %v5701_v42  ;;  %v5712_v42 = vld [vmem:[#allocation11 + $0xe4] ss:$28 sps:$4 sm:$0xff]  }
 0x276   :  { %4172 = vmatprep.subr.bf16.mxu0 %v5709_v45  ;;  %v5716_v45 = vld [vmem:[#allocation11 + $0x118] ss:$28 sps:$4 sm:$0xff]  }
 0x279   :  { %4173 = vmatpush1.bf16.msra.mxu0 %v5707_v48  ;;  %v5730_v48 = vld [vmem:[#allocation11 + $0x18c] ss:$28 sps:$4 sm:$0xff]  }
 0x27a   :  { %4174 = vmatprep.subr.bf16.mxu0 %v5715_v50  ;;  %v5736_v50 = vld [vmem:[#allocation11 + $0x1c4] ss:$28 sps:$4 sm:$0xff]  }
 0x27d   :  { %4175 = vmatpush1.bf16.msra.mxu0 %v5713_v51  ;;  %v5734_v51 = vld [vmem:[#allocation11 + $0x1c0] ss:$28 sps:$4 sm:$0xff]  }
 0x27e   :  { %4176 = vmatprep.subr.bf16.mxu0 %v5721_v52  ;;  %v5742_v52 = vld [vmem:[#allocation11 + $0x1fc] ss:$28 sps:$4 sm:$0xff]  }
 0x281   :  { %4177 = vmatpush1.bf16.msra.mxu0 %v5719_v54  ;;  %v5748_v54 = vld [vmem:[#allocation11 + $0x234] ss:$28 sps:$4 sm:$0xff]  }
 0x282   :  { %4178 = vmatprep.subr.bf16.mxu0 %v5727_v55  ;;  %v5746_v55 = vld [vmem:[#allocation11 + $0x230] ss:$28 sps:$4 sm:$0xff]  }
 0x285   :  { %4179 = vmatpush1.bf16.msra.mxu0 %v5725_v58  ;;  %v5760_v58 = vld [vmem:[#allocation11 + $0x2a4] ss:$28 sps:$4 sm:$0xff]  }
 0x286   :  { %4180 = vmatprep.subr.bf16.mxu0 %v5733_v60  ;;  %v5766_v60 = vld [vmem:[#allocation11 + $0x2dc] ss:$28 sps:$4 sm:$0xff]  }
 0x289   :  { %4181 = vmatpush1.bf16.msra.mxu0 %v5731_v0  ;;  %v5775_v0 = vld [vmem:[#allocation11 + $0x31c] ss:$28 sps:$4 sm:$0xff]  }
 0x28a   :  { %4182 = vmatprep.subr.bf16.mxu0 %v5739_v5  ;;  %v5781_v5 = vld [vmem:[#allocation11 + $0x354] ss:$28 sps:$4 sm:$0xff]  }
 0x28d   :  { %4183 = vmatpush1.bf16.msra.mxu0 %v5737_v6  ;;  %v5779_v6 = vld [vmem:[#allocation11 + $0x350] ss:$28 sps:$4 sm:$0xff]  }
 0x28e   :  { %4184 = vmatprep.subr.bf16.mxu0 %v5745_v8  ;;  %v5784_v8 = vld [vmem:[#allocation11 + $0x384] ss:$28 sps:$4 sm:$0xff]  }
 0x291   :  { %4185 = vmatpush1.bf16.msra.mxu0 %v5743_v10 }
 0x292   :  { %4186 = vmatprep.subr.bf16.mxu0 %v5751_v13  ;;  %v6451_v13 = vld [vmem:[%s6538_s7] sm:$0xf] }
 0x295   :  { %4187 = vmatpush1.bf16.msra.mxu0 %v5749_v15  ;;  %v2376_v15 = vrot.slane %v6451_v13, %v6419_v21 }
 0x296   :  { %4188 = vmatprep.subr.bf16.mxu0 %v5757_v17 }
 0x299   :  { %4189 = vmatpush1.bf16.msra.mxu0 %v5755_v20 }
 0x29a   :  { %4190 = vmatprep.subr.bf16.mxu0 %v5763_v24 }
 0x29d   :  { %4191 = vmatpush1.bf16.msra.mxu0 %v5761_v26 }
 0x29e   :  { %4192 = vmatprep.subr.bf16.mxu0 %v5769_v28  ;;  %v5785_v28 = vld [vmem:[#allocation11 + $0x388] ss:$28 sps:$4 sm:$0xff]  }
 0x2a1   :  { %4193 = vmatpush1.bf16.msra.mxu0 %v5767_v30  ;;  %v5790_v30 = vld [vmem:[#allocation11 + $0x3bc] ss:$28 sps:$4 sm:$0xff]  }
 0x2a2   :  { %4194 = vmatprep.subr.bf16.mxu0 %v5775_v0 }
 0x33f   :  { %v2322_v40 = vpop.f32.mrb[4].mxu0 }
 0x340   :  { %v2324_v41 = vpop.f32.mrb[5].mxu0  ;;  %v6443_v61 = vadd.f32 %v2322_v40, %v1920_v56  ;;  %v5706_v40 = vld [vmem:[#allocation11 + $0xac] ss:$28 sps:$4 sm:$0xff]  }
 0x341   :  { %v5136_v43 = vadd.f32 %v2324_v41, %v1924_v38  ;;  %v2326_v44 = vpop.f32.mrb[6].mxu0  ;;  %v5700_v38 = vld [vmem:[#allocation11 + $0x74] ss:$28 sps:$4 sm:$0xff]   ;;  %v5704_v41 = vld [vmem:[#allocation11 + $0xa8] ss:$28 sps:$4 sm:$0xff]  }
 0x342   :  { %v2327_v46 = vpop.f32.mrb[7].mxu0  ;;  %v5718_v44 = vld [vmem:[#allocation11 + $0x11c] ss:$28 sps:$4 sm:$0xff]   ;;  %v5754_v56 = vld [vmem:[#allocation11 + $0x26c] ss:$28 sps:$4 sm:$0xff]  }
 0x343   :  { %v2329_v47 = vmul.f32 0.5, %v5136_v43  ;;  %4485 = vrot.lane.b32.xlu0 %v5136_v43, %s6237_s14  ;;  %v5710_v43 = vld [vmem:[#allocation11 + $0xe0] ss:$28 sps:$4 sm:$0xff]   ;;  %v5724_v46 = vld [vmem:[#allocation11 + $0x154] ss:$28 sps:$4 sm:$0xff]  }
 0x345   :  { %v2330_v49 = vmul.f32 1.442695, %v2329_v47  ;;  %v5722_v47 = vld [vmem:[#allocation11 + $0x150] ss:$28 sps:$4 sm:$0xff]  }
 0x347   :  { %6006 = vpow2.f32 %v2330_v49  ;;  %v5728_v49 = vld [vmem:[#allocation11 + $0x188] ss:$28 sps:$4 sm:$0xff]  }
 0x351   :  { %v6007_v59 = vpop.eup %6006 }
 0x352   :  { %v2332_v62 = vmul.f32 %v6007_v59, %v123_v57  ;;  %v5752_v57 = vld [vmem:[#allocation11 + $0x268] ss:$28 sps:$4 sm:$0xff]   ;;  %v5758_v59 = vld [vmem:[#allocation11 + $0x2a0] ss:$28 sps:$4 sm:$0xff]  }
 0x354   :  { %v2333_v63 = vadd.f32 %v6443_v61, %v2332_v62  ;;  %v5764_v62 = vld [vmem:[#allocation11 + $0x2d8] ss:$28 sps:$4 sm:$0xff]  }
 0x356   :  { %v2334_v2 = vpack.c.bf16 %v2333_v63, %v2333_v63  ;;  %v5772_v63 = vld [vmem:[#allocation11 + $0x314] ss:$28 sps:$4 sm:$0xff]  }
 0x358   :  { %2582 = vmatmul.mubr.bf16.vlgmr.msra.gmra.mrb[4].mxu1 %v2334_v2 }
 0x359   :  { %2591 = vmatpush1.bf16.msra.mxu1 %v5662_v1  ;;  %2622 = vmatprep.mubr.bf16.mxu1 %v6236_v22  ;;  %v5676_v22 = vld [vmem:[#allocation10 + $0x8c] ss:$16 sps:$4 sm:$0xff]   ;;  %v5773_v1 = vld [vmem:[#allocation11 + $0x318] ss:$28 sps:$4 sm:$0xff]  }
 0x35a   :  { %2592 = vmatprep.subr.bf16.mxu1 %v5667_v3  ;;  %4195 = vmatpush1.bf16.msra.mxu0 %v5773_v1  ;;  %v5778_v3 = vld [vmem:[#allocation11 + $0x34c] ss:$28 sps:$4 sm:$0xff]   ;;  %v5832_v1 = vld [vmem:[#allocation11 + $0x544] ss:$28 sps:$4 sm:$0xff]  }
 0x35b   :  { %4196 = vmatprep.subr.bf16.mxu0 %v5781_v5 }
 0x35d   :  { %2593 = vmatpush1.bf16.msra.mxu1 %v5665_v7  ;;  %v5776_v7 = vld [vmem:[#allocation11 + $0x348] ss:$28 sps:$4 sm:$0xff]  }
 0x35e   :  { %2594 = vmatprep.subr.bf16.mxu1 %v5670_v9  ;;  %4197 = vmatpush1.bf16.msra.mxu0 %v5779_v6  ;;  %v5787_v9 = vld [vmem:[#allocation11 + $0x38c] ss:$28 sps:$4 sm:$0xff]   ;;  %v5830_v6 = vld [vmem:[#allocation11 + $0x540] ss:$28 sps:$4 sm:$0xff]  }
 0x35f   :  { %4207 = vmatprep.subr.bf16.mxu0 %v5787_v9  ;;  %v5841_v9 = vld [vmem:[#allocation11 + $0x584] ss:$28 sps:$4 sm:$0xff]  }
 0x361   :  { %2595 = vmatpush1.bf16.msra.mxu1 %v5668_v12 }
 0x362   :  { %2596 = vmatprep.subr.bf16.mxu1 %v5673_v14  ;;  %v2372_v14 = vrot.slane %v6451_v13, %v6411_v19 }
 0x365   :  { %2597 = vmatpush1.bf16.msra.mxu1 %v5671_v16 }
 0x366   :  { %2598 = vmatprep.subr.bf16.mxu1 %v5676_v22 }
 0x369   :  { %2599 = vmatpush1.bf16.msra.mxu1 %v5674_v23 }
 0x36a   :  { %2600 = vmatprep.subr.bf16.mxu1 %v5679_v25 }
 0x36d   :  { %2601 = vmatpush1.bf16.msra.mxu1 %v5677_v27  ;;  %v5782_v27 = vld [vmem:[#allocation11 + $0x380] ss:$28 sps:$4 sm:$0xff]  }
 0x36e   :  { %2602 = vmatprep.subr.bf16.mxu1 %v5682_v29 }
 0x371   :  { %2603 = vmatpush1.bf16.msra.mxu1 %v5680_v31  ;;  %v5793_v31 = vld [vmem:[#allocation11 + $0x3c4] ss:$28 sps:$4 sm:$0xff]  }
 0x372   :  { %2604 = vmatprep.subr.bf16.mxu1 %v5685_v32  ;;  %v5788_v32 = vld [vmem:[#allocation11 + $0x3b8] ss:$28 sps:$4 sm:$0xff]  }
 0x375   :  { %2605 = vmatpush1.bf16.msra.mxu1 %v5683_v33  ;;  %v5791_v33 = vld [vmem:[#allocation11 + $0x3c0] ss:$28 sps:$4 sm:$0xff]  }
 0x376   :  { %4084 = vmatprep.subr.bf16.mxu1 %v5688_v34  ;;  %v5796_v34 = vld [vmem:[#allocation11 + $0x3f4] ss:$28 sps:$4 sm:$0xff]  }
 0x378   :  { %2623 = vmatmul.mubr.bf16.vlgmr.msra.gmra.mrb[8].mxu1 %v2334_v2  ;;  %v5770_v2 = vld [vmem:[#allocation11 + $0x310] ss:$28 sps:$4 sm:$0xff]  }
 0x379   :  { %4085 = vmatpush1.bf16.msra.mxu1 %v5686_v35  ;;  %v5799_v35 = vld [vmem:[#allocation11 + $0x3fc] ss:$28 sps:$4 sm:$0xff]  }
 0x37a   :  { %4086 = vmatprep.subr.bf16.mxu1 %v5694_v36  ;;  %v5794_v36 = vld [vmem:[#allocation11 + $0x3f0] ss:$28 sps:$4 sm:$0xff]  }
 0x37d   :  { %4087 = vmatpush1.bf16.msra.mxu1 %v5692_v37  ;;  %v5797_v37 = vld [vmem:[#allocation11 + $0x3f8] ss:$28 sps:$4 sm:$0xff]  }
 0x37e   :  { %4088 = vmatprep.subr.bf16.mxu1 %v5700_v38  ;;  %v5802_v38 = vld [vmem:[#allocation11 + $0x42c] ss:$28 sps:$4 sm:$0xff]  }
 0x381   :  { %4089 = vmatpush1.bf16.msra.mxu1 %v5698_v39  ;;  %v5805_v39 = vld [vmem:[#allocation11 + $0x434] ss:$28 sps:$4 sm:$0xff]  }
 0x382   :  { %4090 = vmatprep.subr.bf16.mxu1 %v5706_v40  ;;  %v5800_v40 = vld [vmem:[#allocation11 + $0x428] ss:$28 sps:$4 sm:$0xff]  }
 0x385   :  { %4091 = vmatpush1.bf16.msra.mxu1 %v5704_v41  ;;  %v5803_v41 = vld [vmem:[#allocation11 + $0x430] ss:$28 sps:$4 sm:$0xff]  }
 0x386   :  { %4092 = vmatprep.subr.bf16.mxu1 %v5712_v42  ;;  %v5808_v42 = vld [vmem:[#allocation11 + $0x464] ss:$28 sps:$4 sm:$0xff]  }
 0x389   :  { %4093 = vmatpush1.bf16.msra.mxu1 %v5710_v43  ;;  %v5811_v43 = vld [vmem:[#allocation11 + $0x46c] ss:$28 sps:$4 sm:$0xff]  }
 0x38a   :  { %4094 = vmatprep.subr.bf16.mxu1 %v5718_v44  ;;  %v5806_v44 = vld [vmem:[#allocation11 + $0x460] ss:$28 sps:$4 sm:$0xff]  }
 0x38d   :  { %4095 = vmatpush1.bf16.msra.mxu1 %v5716_v45  ;;  %v5809_v45 = vld [vmem:[#allocation11 + $0x468] ss:$28 sps:$4 sm:$0xff]  }
 0x38e   :  { %4096 = vmatprep.subr.bf16.mxu1 %v5724_v46  ;;  %v5814_v46 = vld [vmem:[#allocation11 + $0x49c] ss:$28 sps:$4 sm:$0xff]  }
 0x391   :  { %4097 = vmatpush1.bf16.msra.mxu1 %v5722_v47  ;;  %v5817_v47 = vld [vmem:[#allocation11 + $0x4a4] ss:$28 sps:$4 sm:$0xff]  }
 0x392   :  { %4098 = vmatprep.subr.bf16.mxu1 %v5730_v48  ;;  %v5812_v48 = vld [vmem:[#allocation11 + $0x498] ss:$28 sps:$4 sm:$0xff]  }
 0x395   :  { %4099 = vmatpush1.bf16.msra.mxu1 %v5728_v49  ;;  %v5815_v49 = vld [vmem:[#allocation11 + $0x4a0] ss:$28 sps:$4 sm:$0xff]  }
 0x396   :  { %4100 = vmatprep.subr.bf16.mxu1 %v5736_v50  ;;  %v5820_v50 = vld [vmem:[#allocation11 + $0x4d4] ss:$28 sps:$4 sm:$0xff]  }
 0x399   :  { %4101 = vmatpush1.bf16.msra.mxu1 %v5734_v51  ;;  %v5823_v51 = vld [vmem:[#allocation11 + $0x4dc] ss:$28 sps:$4 sm:$0xff]  }
 0x39a   :  { %4102 = vmatprep.subr.bf16.mxu1 %v5742_v52  ;;  %v2384_v52 = vrot.slane %v6451_v13, %v6422_v11 }
 0x39d   :  { %4103 = vmatpush1.bf16.msra.mxu1 %v5740_v53  ;;  %v5818_v53 = vld [vmem:[#allocation11 + $0x4d0] ss:$28 sps:$4 sm:$0xff]  }
 0x39e   :  { %4104 = vmatprep.subr.bf16.mxu1 %v5748_v54  ;;  %v5821_v54 = vld [vmem:[#allocation11 + $0x4d8] ss:$28 sps:$4 sm:$0xff]  }
 0x3a1   :  { %4105 = vmatpush1.bf16.msra.mxu1 %v5746_v55  ;;  %v5826_v55 = vld [vmem:[#allocation11 + $0x50c] ss:$28 sps:$4 sm:$0xff]  }
 0x3a2   :  { %4106 = vmatprep.subr.bf16.mxu1 %v5754_v56  ;;  %v5829_v56 = vld [vmem:[#allocation11 + $0x514] ss:$28 sps:$4 sm:$0xff]  }
 0x3a5   :  { %4107 = vmatpush1.bf16.msra.mxu1 %v5752_v57 }
 0x3a6   :  { %4108 = vmatprep.subr.bf16.mxu1 %v5760_v58 }
 0x3a9   :  { %4109 = vmatpush1.bf16.msra.mxu1 %v5758_v59 }
 0x3aa   :  { %4110 = vmatprep.subr.bf16.mxu1 %v5766_v60 }
 0x3ad   :  { %4111 = vmatpush1.bf16.msra.mxu1 %v5764_v62  ;;  %v5824_v62 = vld [vmem:[#allocation11 + $0x508] ss:$28 sps:$4 sm:$0xff]  }
 0x3ae   :  { %4112 = vmatprep.subr.bf16.mxu1 %v5772_v63  ;;  %v5827_v63 = vld [vmem:[#allocation11 + $0x510] ss:$28 sps:$4 sm:$0xff]  }
 0x3b1   :  { %4113 = vmatpush1.bf16.msra.mxu1 %v5770_v2  ;;  %v5835_v2 = vld [vmem:[#allocation11 + $0x54c] ss:$28 sps:$4 sm:$0xff]  }
 0x3b2   :  { %4114 = vmatprep.subr.bf16.mxu1 %v5778_v3 }
 0x3b5   :  { %v4486_v10 = vpop.permute.xlu0 %4485  ;;  %4115 = vmatpush1.bf16.msra.mxu1 %v5776_v7  ;;  %v5833_v7 = vld [vmem:[#allocation11 + $0x548] ss:$28 sps:$4 sm:$0xff]  }
 0x3b6   :  { %v4487_v12 = vadd.f32 %v6443_v61, %v4486_v10  ;;  %4125 = vmatprep.subr.bf16.mxu1 %v5784_v8  ;;  %v5838_v8 = vld [vmem:[#allocation11 + $0x57c] ss:$28 sps:$4 sm:$0xff]  }
 0x3b7   :  { %v5836_v10 = vld [vmem:[#allocation11 + $0x578] ss:$28 sps:$4 sm:$0xff]  }
 0x3b8   :  { %4488 = vst [vmem:[#allocation14] sm:$0xff] %v4487_v12  ;;  %v5839_v12 = vld [vmem:[#allocation11 + $0x580] ss:$28 sps:$4 sm:$0xff]  }
 0x42b   :  { %v2583_v16 = vpop.f32.mrb[4].mxu1 }
 0x42c   :  { %v2584_v17 = vadd.f32 %v2583_v16, %v2372_v14  ;;  %v2585_v22 = vpop.f32.mrb[5].mxu1  ;;  %v5844_v14 = vld [vmem:[#allocation11 + $0x5b4] ss:$28 sps:$4 sm:$0xff]  }
 0x42d   :  { %v2586_v20 = vadd.f32 %v2585_v22, %v2376_v15  ;;  %v2587_v23 = vpop.f32.mrb[6].mxu1  ;;  %v5847_v15 = vld [vmem:[#allocation11 + $0x5bc] ss:$28 sps:$4 sm:$0xff]   ;;  %v5842_v16 = vld [vmem:[#allocation11 + $0x5b0] ss:$28 sps:$4 sm:$0xff]  }
 0x42e   :  { %v2631_v24 = vmax.f32 %v2584_v17, 0.0  ;;  %v2588_v61 = vpop.f32.mrb[7].mxu1  ;;  %v5845_v17 = vld [vmem:[#allocation11 + $0x5b8] ss:$28 sps:$4 sm:$0xff]   ;;  %v5850_v22 = vld [vmem:[#allocation11 + $0x5ec] ss:$28 sps:$4 sm:$0xff]  }
 0x42f   :  { %v2632_v25 = vmax.f32 %v2586_v20, 0.0  ;;  %v5853_v20 = vld [vmem:[#allocation11 + $0x5f4] ss:$28 sps:$4 sm:$0xff]   ;;  %v5848_v23 = vld [vmem:[#allocation11 + $0x5e8] ss:$28 sps:$4 sm:$0xff]  }
 0x430   :  { %v6459_v29 = vpack.c.bf16 %v2631_v24, %v2631_v24  ;;  %v5851_v24 = vld [vmem:[#allocation11 + $0x5f0] ss:$28 sps:$4 sm:$0xff]   ;;  %v5856_v61 = vld [vmem:[#allocation11 + $0x624] ss:$28 sps:$4 sm:$0xff]  }
 0x431   :  { %v6457_v26 = vpack.c.bf16 %v2632_v25, %v2632_v25  ;;  %v5859_v25 = vld [vmem:[#allocation11 + $0x62c] ss:$28 sps:$4 sm:$0xff]  }
 0x433   :  { %4116 = vmatprep.mubr.bf16.mxu1 %v6457_v26  ;;  %4198 = vmatprep.mubr.bf16.mxu0 %v6457_v26 }
 0x434   :  { %4117 = vmatmul.mubr.bf16.vlgmr.msra.gmra.mrb[12].mxu1 %v6459_v29  ;;  %4199 = vmatmul.mubr.bf16.vlgmr.msra.gmra.mrb[8].mxu0 %v6459_v29 }
 0x435   :  { %4126 = vmatpush1.bf16.msra.mxu1 %v5782_v27  ;;  %4208 = vmatpush1.bf16.msra.mxu0 %v5785_v28  ;;  %v5854_v27 = vld [vmem:[#allocation11 + $0x620] ss:$28 sps:$4 sm:$0xff]   ;;  %v5857_v28 = vld [vmem:[#allocation11 + $0x628] ss:$28 sps:$4 sm:$0xff]  }
 0x436   :  { %4127 = vmatprep.subr.bf16.mxu1 %v5790_v30  ;;  %4209 = vmatprep.subr.bf16.mxu0 %v5793_v31  ;;  %v5862_v30 = vld [vmem:[#allocation11 + $0x65c] ss:$28 sps:$4 sm:$0xff]   ;;  %v5865_v31 = vld [vmem:[#allocation11 + $0x664] ss:$28 sps:$4 sm:$0xff]  }
 0x439   :  { %4128 = vmatpush1.bf16.msra.mxu1 %v5788_v32  ;;  %4210 = vmatpush1.bf16.msra.mxu0 %v5791_v33  ;;  %v5860_v32 = vld [vmem:[#allocation11 + $0x658] ss:$28 sps:$4 sm:$0xff]   ;;  %v5863_v33 = vld [vmem:[#allocation11 + $0x660] ss:$28 sps:$4 sm:$0xff]  }
 0x43a   :  { %4129 = vmatprep.subr.bf16.mxu1 %v5796_v34  ;;  %4211 = vmatprep.subr.bf16.mxu0 %v5799_v35  ;;  %v2380_v34 = vrot.slane %v6451_v13, %v6433_v4  ;;  %v5868_v35 = vld [vmem:[#allocation11 + $0x694] ss:$28 sps:$4 sm:$0xff]  }
 0x43b   :  { %v5880_v13 = vld [vmem:[#allocation11 + $0x14] ss:$28 sps:$4 sm:$0xff]  }
 0x43d   :  { %4130 = vmatpush1.bf16.msra.mxu1 %v5794_v36  ;;  %4212 = vmatpush1.bf16.msra.mxu0 %v5797_v37  ;;  %v5871_v36 = vld [vmem:[#allocation11 + $0x69c] ss:$28 sps:$4 sm:$0xff]   ;;  %v5866_v37 = vld [vmem:[#allocation11 + $0x690] ss:$28 sps:$4 sm:$0xff]  }
 0x43e   :  { %4131 = vmatprep.subr.bf16.mxu1 %v5802_v38  ;;  %4213 = vmatprep.subr.bf16.mxu0 %v5805_v39  ;;  %v5869_v38 = vld [vmem:[#allocation11 + $0x698] ss:$28 sps:$4 sm:$0xff]  }
 0x441   :  { %4132 = vmatpush1.bf16.msra.mxu1 %v5800_v40  ;;  %4214 = vmatpush1.bf16.msra.mxu0 %v5803_v41  ;;  %v5874_v40 = vld [vmem:[#allocation11 + $0x6cc] ss:$28 sps:$4 sm:$0xff]   ;;  %v5877_v41 = vld [vmem:[#allocation11 + $0x6d4] ss:$28 sps:$4 sm:$0xff]  }
 0x442   :  { %4133 = vmatprep.subr.bf16.mxu1 %v5808_v42  ;;  %4215 = vmatprep.subr.bf16.mxu0 %v5811_v43  ;;  %v5872_v42 = vld [vmem:[#allocation11 + $0x6c8] ss:$28 sps:$4 sm:$0xff]   ;;  %v5875_v43 = vld [vmem:[#allocation11 + $0x6d0] ss:$28 sps:$4 sm:$0xff]  }
 0x445   :  { %4134 = vmatpush1.bf16.msra.mxu1 %v5806_v44  ;;  %4216 = vmatpush1.bf16.msra.mxu0 %v5809_v45  ;;  %v5881_v45 = vld [vmem:[#allocation11 + $0x1d8] ss:$28 sps:$4 sm:$0xff]  }
 0x446   :  { %4135 = vmatprep.subr.bf16.mxu1 %v5814_v46  ;;  %4217 = vmatprep.subr.bf16.mxu0 %v5817_v47  ;;  %v5878_v46 = vld [vmem:[#allocation11 + $0x10] ss:$28 sps:$4 sm:$0xff]  }
 0x449   :  { %4136 = vmatpush1.bf16.msra.mxu1 %v5812_v48  ;;  %4218 = vmatpush1.bf16.msra.mxu0 %v5815_v49  ;;  %v5882_v48 = vld [vmem:[#allocation11 + $0x18] ss:$28 sps:$4 sm:$0xff]   ;;  %v5885_v49 = vld [vmem:[#allocation11 + $0x4c] ss:$28 sps:$4 sm:$0xff]  }
 0x44a   :  { %4137 = vmatprep.subr.bf16.mxu1 %v5820_v50  ;;  %4219 = vmatprep.subr.bf16.mxu0 %v5823_v51  ;;  %v5886_v50 = vld [vmem:[#allocation11 + $0x210] ss:$28 sps:$4 sm:$0xff]   ;;  %v5883_v51 = vld [vmem:[#allocation11 + $0x48] ss:$28 sps:$4 sm:$0xff]  }
 0x44b   :  { %v6467_v57 = vpop.f32.mrb[8].mxu1 }
 0x44c   :  { %v2626_v58 = vpop.f32.mrb[9].mxu1  ;;  %v2625_v39 = vadd.f32 %v6467_v57, %v2380_v34  ;;  %v5895_v57 = vld [vmem:[#allocation11 + $0xbc] ss:$28 sps:$4 sm:$0xff]  }
 0x44d   :  { %v2627_v59 = vadd.f32 %v2626_v58, %v2384_v52  ;;  %v2628_v60 = vpop.f32.mrb[10].mxu1  ;;  %4138 = vmatpush1.bf16.msra.mxu1 %v5818_v53  ;;  %4220 = vmatpush1.bf16.msra.mxu0 %v5821_v54  ;;  %v5887_v52 = vld [vmem:[#allocation11 + $0x50] ss:$28 sps:$4 sm:$0xff]   ;;  %v5890_v53 = vld [vmem:[#allocation11 + $0x84] ss:$28 sps:$4 sm:$0xff]  }
 0x44e   :  { %v2629_v0 = vpop.f32.mrb[11].mxu1  ;;  %4139 = vmatprep.subr.bf16.mxu1 %v5826_v55  ;;  %4221 = vmatprep.subr.bf16.mxu0 %v5829_v56  ;;  %v2633_v44 = vmax.f32 %v2625_v39, 0.0  ;;  %v5891_v54 = vld [vmem:[#allocation11 + $0x248] ss:$28 sps:$4 sm:$0xff]   ;;  %v5888_v55 = vld [vmem:[#allocation11 + $0x80] ss:$28 sps:$4 sm:$0xff]  }
 0x44f   :  { %v2634_v3 = vmax.f32 %v2627_v59, 0.0  ;;  %v5892_v56 = vld [vmem:[#allocation11 + $0x88] ss:$28 sps:$4 sm:$0xff]   ;;  %v5896_v58 = vld [vmem:[#allocation11 + $0x280] ss:$28 sps:$4 sm:$0xff]  }
 0x450   :  { %v6476_v47 = vpack.c.bf16 %v2633_v44, %v2633_v44  ;;  %v5893_v59 = vld [vmem:[#allocation11 + $0xb8] ss:$28 sps:$4 sm:$0xff]   ;;  %v5897_v60 = vld [vmem:[#allocation11 + $0xc0] ss:$28 sps:$4 sm:$0xff]   ;;  %v5938_v39 = vld [vmem:[#allocation11 + $0x2b0] ss:$28 sps:$4 sm:$0xff]  }
 0x451   :  { %v6469_v5 = vpack.c.bf16 %v2634_v3, %v2634_v3  ;;  %4140 = vmatpush1.bf16.msra.mxu1 %v5824_v62  ;;  %4222 = vmatpush1.bf16.msra.mxu0 %v5827_v63  ;;  %v5900_v62 = vld [vmem:[#allocation11 + $0xf4] ss:$28 sps:$4 sm:$0xff]   ;;  %v5903_v3 = vld [vmem:[#allocation11 + $0x128] ss:$28 sps:$4 sm:$0xff]   ;;  %v5936_v34 = vld [vmem:[#allocation11 + $0x600] ss:$28 sps:$4 sm:$0xff]  }
 0x452   :  { %4141 = vmatprep.subr.bf16.mxu1 %v5832_v1  ;;  %4223 = vmatprep.subr.bf16.mxu0 %v5835_v2  ;;  %v5898_v63 = vld [vmem:[#allocation11 + $0xf0] ss:$28 sps:$4 sm:$0xff]   ;;  %v5902_v0 = vld [vmem:[#allocation11 + $0xf8] ss:$28 sps:$4 sm:$0xff]  }
 0x453   :  { %4157 = vmatprep.mubr.bf16.mxu1 %v6469_v5  ;;  %4239 = vmatprep.mubr.bf16.mxu0 %v6469_v5  ;;  %v5905_v1 = vld [vmem:[#allocation11 + $0x12c] ss:$28 sps:$4 sm:$0xff]  }
 0x454   :  { %v5906_v2 = vld [vmem:[#allocation11 + $0x2f0] ss:$28 sps:$4 sm:$0xff]  }
 0x455   :  { %4142 = vmatpush1.bf16.msra.mxu1 %v5830_v6  ;;  %4224 = vmatpush1.bf16.msra.mxu0 %v5833_v7  ;;  %v5907_v6 = vld [vmem:[#allocation11 + $0x130] ss:$28 sps:$4 sm:$0xff]   ;;  %v5910_v7 = vld [vmem:[#allocation11 + $0x164] ss:$28 sps:$4 sm:$0xff]  }
 0x456   :  { %4143 = vmatprep.subr.bf16.mxu1 %v5838_v8  ;;  %4225 = vmatprep.subr.bf16.mxu0 %v5841_v9  ;;  %v5911_v8 = vld [vmem:[#allocation11 + $0x328] ss:$28 sps:$4 sm:$0xff]   ;;  %v5908_v9 = vld [vmem:[#allocation11 + $0x160] ss:$28 sps:$4 sm:$0xff]   ;;  %v5947_v44 = vld [vmem:[#allocation11 + $0x4b0] ss:$28 sps:$4 sm:$0xff]  }
 0x459   :  { %4144 = vmatpush1.bf16.msra.mxu1 %v5836_v10  ;;  %4226 = vmatpush1.bf16.msra.mxu0 %v5839_v12  ;;  %v5912_v10 = vld [vmem:[#allocation11 + $0x168] ss:$28 sps:$4 sm:$0xff]   ;;  %v5915_v12 = vld [vmem:[#allocation11 + $0x19c] ss:$28 sps:$4 sm:$0xff]  }
 0x45a   :  { %4145 = vmatprep.subr.bf16.mxu1 %v5844_v14  ;;  %4227 = vmatprep.subr.bf16.mxu0 %v5847_v15  ;;  %v5916_v14 = vld [vmem:[#allocation11 + $0x360] ss:$28 sps:$4 sm:$0xff]   ;;  %v5913_v15 = vld [vmem:[#allocation11 + $0x198] ss:$28 sps:$4 sm:$0xff]  }
 0x45d   :  { %4146 = vmatpush1.bf16.msra.mxu1 %v5842_v16  ;;  %4228 = vmatpush1.bf16.msra.mxu0 %v5845_v17  ;;  %v5917_v16 = vld [vmem:[#allocation11 + $0x1a0] ss:$28 sps:$4 sm:$0xff]   ;;  %v5920_v17 = vld [vmem:[#allocation11 + $0x1d4] ss:$28 sps:$4 sm:$0xff]  }
 0x45e   :  { %4147 = vmatprep.subr.bf16.mxu1 %v5850_v22  ;;  %4229 = vmatprep.subr.bf16.mxu0 %v5853_v20  ;;  %v5921_v22 = vld [vmem:[#allocation11 + $0x558] ss:$28 sps:$4 sm:$0xff]   ;;  %v5918_v20 = vld [vmem:[#allocation11 + $0x1d0] ss:$28 sps:$4 sm:$0xff]  }
 0x461   :  { %4148 = vmatpush1.bf16.msra.mxu1 %v5848_v23  ;;  %4230 = vmatpush1.bf16.msra.mxu0 %v5851_v24  ;;  %v5922_v23 = vld [vmem:[#allocation11 + $0x398] ss:$28 sps:$4 sm:$0xff]   ;;  %v5925_v24 = vld [vmem:[#allocation11 + $0x20c] ss:$28 sps:$4 sm:$0xff]  }
 0x462   :  { %4149 = vmatprep.subr.bf16.mxu1 %v5856_v61  ;;  %4231 = vmatprep.subr.bf16.mxu0 %v5859_v25  ;;  %v5926_v61 = vld [vmem:[#allocation11 + $0x590] ss:$28 sps:$4 sm:$0xff]   ;;  %v5923_v25 = vld [vmem:[#allocation11 + $0x208] ss:$28 sps:$4 sm:$0xff]  }
 0x465   :  { %4150 = vmatpush1.bf16.msra.mxu1 %v5854_v27  ;;  %4232 = vmatpush1.bf16.msra.mxu0 %v5857_v28  ;;  %v5927_v27 = vld [vmem:[#allocation11 + $0x3d0] ss:$28 sps:$4 sm:$0xff]   ;;  %v5930_v28 = vld [vmem:[#allocation11 + $0x244] ss:$28 sps:$4 sm:$0xff]  }
 0x466   :  { %4151 = vmatprep.subr.bf16.mxu1 %v5862_v30  ;;  %4233 = vmatprep.subr.bf16.mxu0 %v5865_v31  ;;  %v5931_v30 = vld [vmem:[#allocation11 + $0x5c8] ss:$28 sps:$4 sm:$0xff]   ;;  %v5928_v31 = vld [vmem:[#allocation11 + $0x240] ss:$28 sps:$4 sm:$0xff]  }
 0x469   :  { %4152 = vmatpush1.bf16.msra.mxu1 %v5860_v32  ;;  %4234 = vmatpush1.bf16.msra.mxu0 %v5863_v33  ;;  %v5932_v32 = vld [vmem:[#allocation11 + $0x408] ss:$28 sps:$4 sm:$0xff]   ;;  %v5935_v33 = vld [vmem:[#allocation11 + $0x27c] ss:$28 sps:$4 sm:$0xff]  }
 0x46a   :  { %4153 = vmatprep.subr.bf16.mxu1 %v5868_v35  ;;  %4235 = vmatprep.subr.bf16.mxu0 %v5871_v36  ;;  %v5933_v35 = vld [vmem:[#allocation11 + $0x278] ss:$28 sps:$4 sm:$0xff]   ;;  %v5937_v36 = vld [vmem:[#allocation11 + $0x440] ss:$28 sps:$4 sm:$0xff]  }
 0x46d   :  { %4154 = vmatpush1.bf16.msra.mxu1 %v5866_v37  ;;  %4236 = vmatpush1.bf16.msra.mxu0 %v5869_v38  ;;  %v5940_v37 = vld [vmem:[#allocation11 + $0x2b4] ss:$28 sps:$4 sm:$0xff]  }
 0x46e   :  { %4155 = vmatprep.subr.bf16.mxu1 %v5874_v40  ;;  %4237 = vmatprep.subr.bf16.mxu0 %v5877_v41  ;;  %v5941_v38 = vld [vmem:[#allocation11 + $0x638] ss:$28 sps:$4 sm:$0xff]   ;;  %v5945_v41 = vld [vmem:[#allocation11 + $0x2ec] ss:$28 sps:$4 sm:$0xff]  }
 0x46f   :  { %v5942_v40 = vld [vmem:[#allocation11 + $0x478] ss:$28 sps:$4 sm:$0xff]  }
 0x471   :  { %4156 = vmatpush1.bf16.msra.mxu1 %v5872_v42  ;;  %4238 = vmatpush1.bf16.msra.mxu0 %v5875_v43  ;;  %v5946_v42 = vld [vmem:[#allocation11 + $0x670] ss:$28 sps:$4 sm:$0xff]   ;;  %v5943_v43 = vld [vmem:[#allocation11 + $0x2e8] ss:$28 sps:$4 sm:$0xff]  }
 0x472   :  { %4248 = vmatprep.subr.bf16.mxu1 %v5880_v13  ;;  %5087 = vmatprep.subr.bf16.mxu0 %v5881_v45  ;;  %v5950_v13 = vld [vmem:[#allocation11 + $0x324] ss:$28 sps:$4 sm:$0xff]  }
 0x473   :  { %v5951_v45 = vld [vmem:[#allocation11 + $0x6a8] ss:$28 sps:$4 sm:$0xff]  }
 0x474   :  { %4158 = vmatmul.mubr.bf16.vlgmr.msra.gmra.mrb[12].mxu1 %v6476_v47  ;;  %4240 = vmatmul.mubr.bf16.vlgmr.msra.gmra.mrb[8].mxu0 %v6476_v47 }
 0x475   :  { %4249 = vmatpush1.bf16.msra.mxu1 %v5878_v46  ;;  %4280 = vmatprep.mubr.bf16.mxu1 %v6457_v26  ;;  %v5948_v46 = vld [vmem:[#allocation11 + $0x320] ss:$28 sps:$4 sm:$0xff]  }
 0x476   :  { %5088 = vmatpush3.bf16.msra.mxu0 %v5882_v48  ;;  %4362 = vmatprep.mubr.bf16.mxu0 %v6457_v26  ;;  %v5901_v26 = vld [vmem:[#allocation11 + $0x2b8] ss:$28 sps:$4 sm:$0xff]   ;;  %v5952_v48 = vld [vmem:[#allocation11 + $0x4e8] ss:$28 sps:$4 sm:$0xff]  }
 0x477   :  { %4250 = vmatprep.subr.bf16.mxu1 %v5885_v49  ;;  %5089 = vmatprep.subr.bf16.mxu0 %v5886_v50  ;;  %v5955_v49 = vld [vmem:[#allocation11 + $0x35c] ss:$28 sps:$4 sm:$0xff]  }
 0x478   :  { %v5956_v50 = vld [vmem:[#allocation11 + $0x6e0] ss:$28 sps:$4 sm:$0xff]  }
 0x479   :  { %4251 = vmatpush1.bf16.msra.mxu1 %v5883_v51  ;;  %v5953_v51 = vld [vmem:[#allocation11 + $0x358] ss:$28 sps:$4 sm:$0xff]  }
 0x47a   :  { %5090 = vmatpush3.bf16.msra.mxu0 %v5887_v52  ;;  %4252 = vmatprep.subr.bf16.mxu1 %v5890_v53  ;;  %v5957_v52 = vld [vmem:[#allocation11 + $0x520] ss:$28 sps:$4 sm:$0xff]   ;;  %v5960_v53 = vld [vmem:[#allocation11 + $0x394] ss:$28 sps:$4 sm:$0xff]  }
 0x47b   :  { %5091 = vmatprep.subr.bf16.mxu0 %v5891_v54  ;;  %v5958_v54 = vld [vmem:[#allocation11 + $0x390] ss:$28 sps:$4 sm:$0xff]  }
 0x47d   :  { %4253 = vmatpush1.bf16.msra.mxu1 %v5888_v55  ;;  %v5963_v55 = vld [vmem:[#allocation11 + $0x3cc] ss:$28 sps:$4 sm:$0xff]  }
 0x47e   :  { %5092 = vmatpush3.bf16.msra.mxu0 %v5892_v56  ;;  %4254 = vmatprep.subr.bf16.mxu1 %v5895_v57  ;;  %v5961_v56 = vld [vmem:[#allocation11 + $0x3c8] ss:$28 sps:$4 sm:$0xff]  }
 0x47f   :  { %5093 = vmatprep.subr.bf16.mxu0 %v5896_v58  ;;  %v5966_v57 = vld [vmem:[#allocation11 + $0x404] ss:$28 sps:$4 sm:$0xff]  }
 0x480   :  { %v5964_v58 = vld [vmem:[#allocation11 + $0x400] ss:$28 sps:$4 sm:$0xff]  }
 0x481   :  { %4255 = vmatpush1.bf16.msra.mxu1 %v5893_v59  ;;  %v5969_v59 = vld [vmem:[#allocation11 + $0x43c] ss:$28 sps:$4 sm:$0xff]  }
 0x482   :  { %5094 = vmatpush3.bf16.msra.mxu0 %v5897_v60  ;;  %4256 = vmatprep.subr.bf16.mxu1 %v5900_v62  ;;  %v5967_v60 = vld [vmem:[#allocation11 + $0x438] ss:$28 sps:$4 sm:$0xff]  }
 0x483   :  { %5095 = vmatprep.subr.bf16.mxu0 %v5901_v26  ;;  %v5972_v62 = vld [vmem:[#allocation11 + $0x474] ss:$28 sps:$4 sm:$0xff]  }
 0x484   :  { %v5970_v26 = vld [vmem:[#allocation11 + $0x470] ss:$28 sps:$4 sm:$0xff]  }
 0x485   :  { %4257 = vmatpush1.bf16.msra.mxu1 %v5898_v63  ;;  %v5973_v63 = vld [vmem:[#allocation11 + $0x4a8] ss:$28 sps:$4 sm:$0xff]  }
 0x486   :  { %5096 = vmatpush3.bf16.msra.mxu0 %v5902_v0  ;;  %4258 = vmatprep.subr.bf16.mxu1 %v5905_v1  ;;  %v5978_v0 = vld [vmem:[#allocation11 + $0x4e4] ss:$28 sps:$4 sm:$0xff]   ;;  %v5981_v1 = vld [vmem:[#allocation11 + $0x51c] ss:$28 sps:$4 sm:$0xff]  }
 0x487   :  { %5097 = vmatprep.subr.bf16.mxu0 %v5906_v2  ;;  %v5979_v2 = vld [vmem:[#allocation11 + $0x518] ss:$28 sps:$4 sm:$0xff]  }
 0x489   :  { %4259 = vmatpush1.bf16.msra.mxu1 %v5903_v3  ;;  %v5984_v3 = vld [vmem:[#allocation11 + $0x554] ss:$28 sps:$4 sm:$0xff]  }
 0x48a   :  { %5098 = vmatpush3.bf16.msra.mxu0 %v5907_v6  ;;  %4260 = vmatprep.subr.bf16.mxu1 %v5910_v7  ;;  %v5982_v6 = vld [vmem:[#allocation11 + $0x550] ss:$28 sps:$4 sm:$0xff]  }
 0x48b   :  { %5099 = vmatprep.subr.bf16.mxu0 %v5911_v8  ;;  %v5987_v7 = vld [vmem:[#allocation11 + $0x58c] ss:$28 sps:$4 sm:$0xff]  }
 0x48c   :  { %v5985_v8 = vld [vmem:[#allocation11 + $0x588] ss:$28 sps:$4 sm:$0xff]  }
 0x48d   :  { %4261 = vmatpush1.bf16.msra.mxu1 %v5908_v9  ;;  %v5990_v9 = vld [vmem:[#allocation11 + $0x5c4] ss:$28 sps:$4 sm:$0xff]  }
 0x48e   :  { %5100 = vmatpush3.bf16.msra.mxu0 %v5912_v10  ;;  %4262 = vmatprep.subr.bf16.mxu1 %v5915_v12  ;;  %v5988_v10 = vld [vmem:[#allocation11 + $0x5c0] ss:$28 sps:$4 sm:$0xff]  }
 0x48f   :  { %5101 = vmatprep.subr.bf16.mxu0 %v5916_v14  ;;  %v5993_v12 = vld [vmem:[#allocation11 + $0x5fc] ss:$28 sps:$4 sm:$0xff]  }
 0x490   :  { %v5991_v14 = vld [vmem:[#allocation11 + $0x5f8] ss:$28 sps:$4 sm:$0xff]  }
 0x491   :  { %4263 = vmatpush1.bf16.msra.mxu1 %v5913_v15  ;;  %v5996_v15 = vld [vmem:[#allocation11 + $0x634] ss:$28 sps:$4 sm:$0xff]  }
 0x492   :  { %5102 = vmatpush3.bf16.msra.mxu0 %v5917_v16  ;;  %4264 = vmatprep.subr.bf16.mxu1 %v5920_v17  ;;  %v5994_v16 = vld [vmem:[#allocation11 + $0x630] ss:$28 sps:$4 sm:$0xff]  }
 0x493   :  { %5109 = vmatprep.subr.bf16.mxu0 %v5921_v22  ;;  %v5999_v17 = vld [vmem:[#allocation11 + $0x66c] ss:$28 sps:$4 sm:$0xff]  }
 0x494   :  { %v5997_v22 = vld [vmem:[#allocation11 + $0x668] ss:$28 sps:$4 sm:$0xff]  }
 0x495   :  { %4363 = vmatmul.mubr.bf16.vlgmr.msra.gmra.mrb[12].mxu0 %v6459_v29  ;;  %4265 = vmatpush1.bf16.msra.mxu1 %v5918_v20  ;;  %v6002_v20 = vld [vmem:[#allocation11 + $0x6a4] ss:$28 sps:$4 sm:$0xff]  }
 0x496   :  { %5110 = vmatpush3.bf16.msra.mxu0 %v5922_v23  ;;  %4402 = vmatprep.mubr.bf16.mxu0 %v6469_v5  ;;  %v6000_v23 = vld [vmem:[#allocation11 + $0x6a0] ss:$28 sps:$4 sm:$0xff]  }
 0x497   :  { %4266 = vmatprep.subr.bf16.mxu1 %v5925_v24  ;;  %5111 = vmatprep.subr.bf16.mxu0 %v5926_v61  ;;  %v6005_v24 = vld [vmem:[#allocation11 + $0x6dc] ss:$28 sps:$4 sm:$0xff]  }
 0x498   :  { %v6003_v61 = vld [vmem:[#allocation11 + $0x6d8] ss:$28 sps:$4 sm:$0xff]  }
 0x499   :  { %4267 = vmatpush1.bf16.msra.mxu1 %v5923_v25  ;;  %v6491_v25 = vld [vmem:[%s6540_s9] sm:$0xff]  ;;  %s6238_s9 = smov [#allocation14]  }
 0x49a   :  { %5112 = vmatpush3.bf16.msra.mxu0 %v5927_v27  ;;  %4268 = vmatprep.subr.bf16.mxu1 %v5930_v28  ;;  %v2900_v27 = vrot.slane %v6491_v25, %v6411_v19  ;;  %v2908_v28 = vrot.slane %v6491_v25, %v6433_v4  ;;  %s4505_s20 = sshll.u32 %s6238_s9, 4  ;;  %s4506_s20 = int_to_ptr.vmem [resolvable:$true] %s4505_s20 }
 0x49b   :  { %5113 = vmatprep.subr.bf16.mxu0 %v5931_v30  ;;  %v2904_v30 = vrot.slane %v6491_v25, %v6419_v21  ;;  %s6168_s16 = scalar_lea.vmem %s4506_s20, 128  ;;  %p6173_p7 = scmp.lt.s32.totalorder %s4506_s20, %s4506_s20 }
 0x49c   :  { %p6169_p6 = scmp.ne.s32.totalorder %s4506_s20, %s6168_s16  ;;  %p6174_p8 = scmp.lt.s32.totalorder %s6168_s16, %s6168_s16 }
 0x49d   :  { %4269 = vmatpush1.bf16.msra.mxu1 %v5928_v31  ;;  %v2912_v31 = vrot.slane %v6491_v25, %v6422_v11 }
 0x49e   :  { %5114 = vmatpush3.bf16.msra.mxu0 %v5932_v32  ;;  %4270 = vmatprep.subr.bf16.mxu1 %v5935_v33  ;;  %p6175_p9 = por %p6174_p8, %p6173_p7 }
 0x49f   :  { %5115 = vmatprep.subr.bf16.mxu0 %v5936_v34 }
 0x4a0   :  { %p6176_p10 = pnand %p6175_p9, %p6169_p6 }
 0x4a1   :  { %4271 = vmatpush1.bf16.msra.mxu1 %v5933_v35 }
 0x4a2   :  { %5116 = vmatpush3.bf16.msra.mxu0 %v5937_v36  ;;  %4272 = vmatprep.subr.bf16.mxu1 %v5940_v37 }
 0x4a3   :  { %5117 = vmatprep.subr.bf16.mxu0 %v5941_v38 }
 0x4a5   :  { %4273 = vmatpush1.bf16.msra.mxu1 %v5938_v39 }
 0x4a6   :  { %5118 = vmatpush3.bf16.msra.mxu0 %v5942_v40  ;;  %4274 = vmatprep.subr.bf16.mxu1 %v5945_v41 }
 0x4a7   :  { %5119 = vmatprep.subr.bf16.mxu0 %v5946_v42 }
 0x4a9   :  { %4275 = vmatpush1.bf16.msra.mxu1 %v5943_v43 }
 0x4aa   :  { %5120 = vmatpush3.bf16.msra.mxu0 %v5947_v44  ;;  %4276 = vmatprep.subr.bf16.mxu1 %v5950_v13 }
 0x4ab   :  { %5121 = vmatprep.subr.bf16.mxu0 %v5951_v45 }
 0x4ad   :  { %4277 = vmatpush1.bf16.msra.mxu1 %v5948_v46 }
 0x4ae   :  { %5122 = vmatpush3.bf16.msra.mxu0 %v5952_v48  ;;  %4278 = vmatprep.subr.bf16.mxu1 %v5955_v49 }
 0x4af   :  { %5123 = vmatprep.subr.bf16.mxu0 %v5956_v50 }
 0x4b1   :  { %4279 = vmatpush1.bf16.msra.mxu1 %v5953_v51 }
 0x4b2   :  { %5124 = vmatpush3.bf16.msra.mxu0 %v5957_v52  ;;  %4289 = vmatprep.subr.bf16.mxu1 %v5960_v53 }
 0x4b4   :  { %4281 = vmatmul.mubr.bf16.vlgmr.msra.gmra.mrb[16].mxu1 %v6459_v29  ;;  %v5975_v29 = vld [vmem:[#allocation11 + $0x4ac] ss:$28 sps:$4 sm:$0xff]  }
 0x4b5   :  { %4403 = vmatmul.mubr.bf16.vlgmr.msra.gmra.mrb[16].mxu0 %v6476_v47  ;;  %4290 = vmatpush1.bf16.msra.mxu1 %v5958_v54 }
 0x4b6   :  { %4321 = vmatprep.mubr.bf16.mxu1 %v6469_v5  ;;  %4291 = vmatprep.subr.bf16.mxu1 %v5963_v55  ;;  %v5976_v5 = vld [vmem:[#allocation11 + $0x4e0] ss:$28 sps:$4 sm:$0xff]  }
 0x4b9   :  { %4292 = vmatpush1.bf16.msra.mxu1 %v5961_v56 }
 0x4ba   :  { %4293 = vmatprep.subr.bf16.mxu1 %v5966_v57 }
 0x4bd   :  { %4294 = vmatpush1.bf16.msra.mxu1 %v5964_v58 }
 0x4be   :  { %4295 = vmatprep.subr.bf16.mxu1 %v5969_v59 }
 0x4c1   :  { %4296 = vmatpush1.bf16.msra.mxu1 %v5967_v60 }
 0x4c2   :  { %4297 = vmatprep.subr.bf16.mxu1 %v5972_v62 }
 0x4c5   :  { %4298 = vmatpush1.bf16.msra.mxu1 %v5970_v26 }
 0x4c6   :  { %4299 = vmatprep.subr.bf16.mxu1 %v5975_v29 }
 0x4c9   :  { %4300 = vmatpush1.bf16.msra.mxu1 %v5973_v63 }
 0x4ca   :  { %4301 = vmatprep.subr.bf16.mxu1 %v5978_v0 }
 0x4cd   :  { %4302 = vmatpush1.bf16.msra.mxu1 %v5976_v5 }
 0x4ce   :  { %4303 = vmatprep.subr.bf16.mxu1 %v5981_v1 }
 0x4d1   :  { %4304 = vmatpush1.bf16.msra.mxu1 %v5979_v2 }
 0x4d2   :  { %4305 = vmatprep.subr.bf16.mxu1 %v5984_v3 }
 0x4d5   :  { %4306 = vmatpush1.bf16.msra.mxu1 %v5982_v6 }
 0x4d6   :  { %4307 = vmatprep.subr.bf16.mxu1 %v5987_v7 }
 0x4d9   :  { %4308 = vmatpush1.bf16.msra.mxu1 %v5985_v8 }
 0x4da   :  { %4309 = vmatprep.subr.bf16.mxu1 %v5990_v9 }
 0x4dd   :  { %4310 = vmatpush1.bf16.msra.mxu1 %v5988_v10 }
 0x4de   :  { %4311 = vmatprep.subr.bf16.mxu1 %v5993_v12 }
 0x4e1   :  { %4312 = vmatpush1.bf16.msra.mxu1 %v5991_v14 }
 0x4e2   :  { %4313 = vmatprep.subr.bf16.mxu1 %v5996_v15 }
 0x4e5   :  { %4314 = vmatpush1.bf16.msra.mxu1 %v5994_v16 }
 0x4e6   :  { %4315 = vmatprep.subr.bf16.mxu1 %v5999_v17 }
 0x4e9   :  { %4316 = vmatpush1.bf16.msra.mxu1 %v5997_v22 }
 0x4ea   :  { %4317 = vmatprep.subr.bf16.mxu1 %v6002_v20 }
 0x4ed   :  { %4318 = vmatpush1.bf16.msra.mxu1 %v6000_v23 }
 0x4ee   :  { %4319 = vmatprep.subr.bf16.mxu1 %v6005_v24 }
 0x4f1   :  { %4320 = vmatpush1.bf16.msra.mxu1 %v6003_v61 }
 0x4f4   :  { %4322 = vmatmul.mubr.bf16.vlgmr.msra.gmra.mrb[16].mxu1 %v6476_v47 }
 0x547   :  { %v4159_v32 = vpop.f32.mrb[12].mxu1  ;;  %v4241_v33 = vpop.f32.mrb[8].mxu0 }
 0x548   :  { %v5137_v47 = vadd.f32 %v4159_v32, %v2900_v27  ;;  %v5139_v34 = vadd.f32 %v4241_v33, %v2908_v28  ;;  %v4161_v35 = vpop.f32.mrb[13].mxu1  ;;  %v4243_v36 = vpop.f32.mrb[9].mxu0 }
 0x549   :  { %v5138_v37 = vadd.f32 %v4161_v35, %v2904_v30  ;;  %v5140_v38 = vadd.f32 %v4243_v36, %v2912_v31  ;;  %v4163_v39 = vpop.f32.mrb[14].mxu1  ;;  %v4245_v40 = vpop.f32.mrb[10].mxu0 }
 0x54a   :  { %v5072_v19 = vmul.f32 -1.442695, %v5137_v47  ;;  %v5074_v41 = vmul.f32 -1.442695, %v5139_v34  ;;  %v4164_v42 = vpop.f32.mrb[15].mxu1  ;;  %v4246_v4 = vpop.f32.mrb[11].mxu0 }
 0x54b   :  { %v5073_v43 = vmul.f32 -1.442695, %v5138_v37  ;;  %v5075_v44 = vmul.f32 -1.442695, %v5140_v38 }
 0x54c   :  { %6008 = vpow2.f32 %v5072_v19 }
 0x54d   :  { %6010 = vpow2.f32 %v5074_v41 }
 0x54e   :  { %6012 = vpow2.f32 %v5073_v43 }
 0x54f   :  { %6014 = vpow2.f32 %v5075_v44 }
 0x556   :  { %v6009_v21 = vpop.eup %6008 }
 0x557   :  { %v6011_v11 = vpop.eup %6010  ;;  %v4431_v13 = vadd.f32 1.0, %v6009_v21 }
 0x558   :  { %v6013_v45 = vpop.eup %6012  ;;  %v4433_v46 = vadd.f32 1.0, %v6011_v11 }
 0x559   :  { %v6015_v48 = vpop.eup %6014  ;;  %6016 = vrcp.f32 %v4431_v13  ;;  %v4432_v49 = vadd.f32 1.0, %v6013_v45 }
 0x55a   :  { %6018 = vrcp.f32 %v4433_v46  ;;  %v4434_v50 = vadd.f32 1.0, %v6015_v48 }
 0x55b   :  { %6020 = vrcp.f32 %v4432_v49 }
 0x55c   :  { %6022 = vrcp.f32 %v4434_v50 }
 0x563   :  { %v6017_v51 = vpop.eup %6016 }
 0x564   :  { %v6019_v52 = vpop.eup %6018 }
 0x565   :  { %v6021_v53 = vpop.eup %6020 }
 0x566   :  { %v6023_v54 = vpop.eup %6022  ;;  %v5083_v55 = vpack.c.bf16 %v6021_v53, %v6017_v51 }
 0x567   :  { %v5084_v56 = vpack.c.bf16 %v6023_v54, %v6019_v52 }
 0x568   :  { %v5103_v57 = vpop.f32.mrb[12].mxu0  ;;  %4481 = vst [vmem:[#allocation13] sm:$0xff] %v5083_v55 }
 0x569   :  { %v5104_v58 = vpop.f32.mrb[13].mxu0  ;;  %4482 = vst [vmem:[#allocation13 + $0x8] sm:$0xff] %v5084_v56 }
 0x56a   :  { %v5105_v59 = vadd.f32 %v5104_v58, %v5103_v57  ;;  %v5106_v60 = vpop.f32.mrb[14].mxu0 }
 0x56b   :  { %6179 = shalt.err (!%p6176_p10)
}
 0x56c   :  { %s6180_s2 = scalar_lea.hbm %s6542_s11, 128 }
 0x56d   :  { %p6181_p11 = scmp.ne.s32.totalorder %s6542_s11, %s6180_s2  ;;  %p6184_p12 = scmp.lt.u32.totalorder %s6180_s2, %s6542_s11 }
 0x56f   :  { %p6186_p13 = pnand %p6184_p12, %p6181_p11 }
 0x571   :  { %6189 = shalt.err (!%p6186_p13)
}
 0x572   :  { %4508 = dma.vmem_to_hbm [thread:$0]  %s4506_s20, 128, %s6542_s11, [#allocation15]   ;;  %v5107_v62 = vpop.f32.mrb[15].mxu0  ;;  %v2923_v26 = vsub.s32 6, %v6408_v18  ;;  %v2915_v14 = vsub.s32 4, %v6408_v18  ;;  %v2919_v15 = vsub.s32 5, %v6408_v18 }
 0x573   :  { %s6239_s11 = smov [#allocation13]  }
 0x574   :  { %v2924_v29 = vrot.slane %v6491_v25, %v2923_v26  ;;  %v2916_v16 = vrot.slane %v6491_v25, %v2915_v14  ;;  %v2920_v17 = vrot.slane %v6491_v25, %v2919_v15  ;;  %s4495_s24 = sshll.u32 %s6239_s11, 4  ;;  %s4496_s24 = int_to_ptr.vmem [resolvable:$true] %s4495_s24 }
 0x575   :  { %s6190_s26 = scalar_lea.vmem %s4496_s24, 448  ;;  %p6195_p1 = scmp.lt.s32.totalorder %s4496_s24, %s4496_s24 }
 0x576   :  { %v4365_v5 = vadd.f32 %v5105_v59, %v2924_v29  ;;  %p6191_p0 = scmp.ne.s32.totalorder %s4496_s24, %s6190_s26  ;;  %p6196_p2 = scmp.lt.s32.totalorder %s6190_s26, %s6190_s26 }
 0x578   :  { %p6197_p3 = por %p6196_p2, %p6195_p1 }
 0x57a   :  { %p6198_p4 = pnand %p6197_p3, %p6191_p0 }
 0x588   :  { %v5125_v63 = vpop.f32.mrb[16].mxu0 }
 0x589   :  { %v5126_v0 = vpop.f32.mrb[17].mxu0 }
 0x58a   :  { %v5127_v1 = vadd.f32 %v5126_v0, %v5125_v63  ;;  %v5128_v2 = vpop.f32.mrb[18].mxu0 }
 0x58b   :  { %v5129_v3 = vpop.f32.mrb[19].mxu0 }
 0x58c   :  { %v4405_v6 = vadd.f32 %v5127_v1, %v4365_v5 }
 0x58e   :  { %v5078_v7 = vmul.f32 -1.442695, %v4405_v6 }
 0x590   :  { %6024 = vpow2.f32 %v5078_v7 }
 0x59a   :  { %v6025_v8 = vpop.eup %6024 }
 0x59b   :  { %v4437_v9 = vadd.f32 1.0, %v6025_v8 }
 0x59d   :  { %6026 = vrcp.f32 %v4437_v9 }
 0x5a7   :  { %v6027_v10 = vpop.eup %6026 }
 0x5a8   :  { %v5086_v12 = vpack.c.bf16 %v6027_v10, %v6027_v10 }
 0x5aa   :  { %4484 = vst [vmem:[#allocation13 + $0x18] sm:$0xf] %v5086_v12 }
 0x5c7   :  { %v4323_v22 = vpop.f32.mrb[16].mxu1 }
 0x5c8   :  { %v5141_v20 = vadd.f32 %v4323_v22, %v2916_v16  ;;  %v4325_v23 = vpop.f32.mrb[17].mxu1 }
 0x5c9   :  { %v5142_v24 = vadd.f32 %v4325_v23, %v2920_v17  ;;  %v4327_v61 = vpop.f32.mrb[18].mxu1 }
 0x5ca   :  { %v5076_v27 = vmul.f32 -1.442695, %v5141_v20  ;;  %v4328_v28 = vpop.f32.mrb[19].mxu1 }
 0x5cb   :  { %v5077_v30 = vmul.f32 -1.442695, %v5142_v24 }
 0x5cc   :  { %6028 = vpow2.f32 %v5076_v27 }
 0x5cd   :  { %6030 = vpow2.f32 %v5077_v30 }
 0x5d6   :  { %v6029_v31 = vpop.eup %6028 }
 0x5d7   :  { %v6031_v32 = vpop.eup %6030  ;;  %v4435_v33 = vadd.f32 1.0, %v6029_v31 }
 0x5d8   :  { %v4436_v47 = vadd.f32 1.0, %v6031_v32 }
 0x5d9   :  { %6032 = vrcp.f32 %v4435_v33 }
 0x5da   :  { %6034 = vrcp.f32 %v4436_v47 }
 0x5e3   :  { %v6033_v18 = vpop.eup %6032 }
 0x5e4   :  { %v6035_v25 = vpop.eup %6034 }
 0x5e5   :  { %v5085_v34 = vpack.c.bf16 %v6035_v25, %v6033_v18 }
 0x5e7   :  { %4483 = vst [vmem:[#allocation13 + $0x10] sm:$0xff] %v5085_v34 }
 0x5e8   :  { %6201 = shalt.err (!%p6198_p4)
}
 0x5e9   :  { %s6202_s6 = scalar_lea.hbm %s6541_s10, 448 }
 0x5ea   :  { %p6203_p5 = scmp.ne.s32.totalorder %s6541_s10, %s6202_s6  ;;  %p6206_p6 = scmp.lt.u32.totalorder %s6202_s6, %s6541_s10 }
 0x5ec   :  { %p6208_p7 = pnand %p6206_p6, %p6203_p5 }
 0x5ee   :  { %6211 = shalt.err (!%p6208_p7)
}
 0x5ef   :  { %4498 = dma.vmem_to_hbm [thread:$0]  %s4496_s24, 448, %s6541_s10, [#allocation4]  }
 0x5f0   :  { %6220 = dma.done.wait [#allocation4], 448  }
 0x5f1   :  { %6221 = vsyncadd [#allocation4], 4294966848 }
 0x5f2   :  { %6222 = dma.done.wait [#allocation15], 128  }
 0x5f3   :  { %6223 = vsyncadd [#allocation15], 4294967168 }
 0x5f4   :  { %4515 = vsyncpa [#allocation3], 1 }
 0x5f5   :  { %4516 = vsyncpa [#allocation6], 1 }
 0x5f6   :  { %4517 = vsyncpa [#allocation9], 1 }
 0x5f7   :  { %4518 = vsyncpa [#allocation12], 1 }
 0x5f8   :  { %4519 = vsyncpa [#allocation4], 1 }
 0x5f9   :  { %4520 = vsyncpa [#allocation15], 1 }

</bundles_post_ra>
